<compile_context>
chip_gen: v7x
topology: tpu7x:2x2x1
jax: 0.10.0
libtpu: 0.0.40
codegen_flags: <defaults>
</compile_context>

<pallas_src>
import jax
import jax.numpy as jnp
import numpy as np
from jax.experimental import pallas as pl
from jax.experimental.pallas import tpu as pltpu

EPSILON = 1e-10
FT = 10                     # conv1 out channels (temporal filters)
FS = 10                     # conv2 out channels (spatial filters)
KW = 17                     # conv1 kernel width
PAD = 8                     # conv1 'same' time padding
POOL_K = 75                 # avg-pool window
POOL_S = 15                 # avg-pool stride
FS_PAD = ((FS + 7) // 8) * 8   # FS rounded up to a sublane multiple (16)


def _dsl_kernel(x_ref, wc_ref, bc_ref, vmask_ref, wfc_ref, bfc_ref,
                out_ref, rate_ref, xpad_s, feat_s):
    TB, MP, T = x_ref.shape
    FSP = bc_ref.shape[0]
    NPF = vmask_ref.shape[0]
    n_pool = NPF // FSP

    # Build the +/-PAD zero halo in VMEM (x is DMA'd exactly once, no host-side pad copy).
    xpad_s[:, :, 0:PAD] = jnp.zeros((TB, MP, PAD), jnp.float32)
    xpad_s[:, :, PAD + T:PAD + T + PAD] = jnp.zeros((TB, MP, PAD), jnp.float32)
    xpad_s[:, :, PAD:PAD + T] = x_ref[...]

    # Hoist all weight loads out of the batch loop (no per-iteration broadcasts).
    wc = wc_ref[...]          # (FSP, KW*MP)  folded conv1∘BN1∘conv2∘BN2
    bc = bc_ref[...]          # (FSP, 1)      folded bias
    vmask = vmask_ref[...]    # (NPF, T)      overlapped avg-pool + flatten mask (1/75 inside window)

    # NOTE: activations kept in f32 for exact parity with the reference; on v6e/v7x the
    # conv/pool path could be switched to bf16 with f32 accumulation (not done on v5e).
    for b in range(TB):       # TB is small & static; all inner m/k/p loops became matmuls.
        # im2col: (KW*MP, T), row index k*MP + m; MP is a multiple of 8 so each concat
        # operand is sublane-tile aligned (no relayouts).
        cols = jnp.concatenate(
            [xpad_s[b, :, k:k + T] for k in range(KW)], axis=0)
        y2 = jnp.dot(wc, cols, preferred_element_type=jnp.float32) + bc   # (FSP, T)
        y2 = y2 * y2
        # Overlapped avg-pool + flatten (p-major) as one masked lane reduction.
        y2_rep = jnp.concatenate([y2] * n_pool, axis=0)                   # (NPF, T)
        pooled = jnp.sum(y2_rep * vmask, axis=1, keepdims=True)           # (NPF, 1)
        feat_s[:, b:b + 1] = jnp.log(jnp.maximum(pooled, EPSILON))

    # One fc1 matmul for the whole batch tile: (MP, NPF) @ (NPF, TB).
    scores = jnp.dot(wfc_ref[...], feat_s[...],
                     preferred_element_type=jnp.float32) + bfc_ref[...]   # (MP, TB)

    # Gumbel eval/inference path: hard threshold at 0; rate == selection.
    # TODO(synk): training-mode Gumbel (sigmoid + gumbel noise) path not implemented.
    sel = (scores >= 0.0).astype(jnp.float32)

    for b in range(TB):
        sb = sel[:, b:b + 1]                                              # (MP, 1)
        rate_ref[b] = sb
        out_ref[b] = x_ref[b] * sb


def dynamic_selection_layer(x, kparams, *, tb=4):
    """x: (B, 1, M, T) float32 (PyTorch NCHW).  Returns (out (B,1,M,T), rate (B,1,M,1))."""
    B, C, M, T = x.shape
    assert C == 1
    assert (T - POOL_K) % POOL_S == 0, "fc1 in_features must be exact ((T-75) % 15 == 0)"
    wc, bc, vmask, wfc_k, bfc_k = kparams
    FSP = bc.shape[0]
    NPF = vmask.shape[0]
    MP = wfc_k.shape[0]

    x3 = x[:, 0]                                            # (B, M, T)
    if MP != M:                                             # pad electrodes to sublane multiple
        x3 = jnp.pad(x3, ((0, 0), (0, MP - M), (0, 0)))

    TB = max(1, min(tb, B))
    Bp = pl.cdiv(B, TB) * TB
    if Bp != B:                                             # pad batch to a multiple of the tile
        x3 = jnp.pad(x3, ((0, Bp - B), (0, 0), (0, 0)))

    out3, rate3 = pl.pallas_call(
        _dsl_kernel,
        out_shape=(jax.ShapeDtypeStruct((Bp, MP, T), jnp.float32),
                   jax.ShapeDtypeStruct((Bp, MP, 1), jnp.float32)),
        grid_spec=pltpu.PrefetchScalarGridSpec(
            num_scalar_prefetch=0,
            grid=(Bp // TB,),
            in_specs=[
                pl.BlockSpec((TB, MP, T), lambda i: (i, 0, 0)),      # x (shipped once)
                pl.BlockSpec((FSP, KW * MP), lambda i: (0, 0)),      # folded conv weights (resident)
                pl.BlockSpec((FSP, 1), lambda i: (0, 0)),            # folded conv bias
                pl.BlockSpec((NPF, T), lambda i: (0, 0)),            # pooling/flatten mask
                pl.BlockSpec((MP, NPF), lambda i: (0, 0)),           # fc1 weight
                pl.BlockSpec((MP, 1), lambda i: (0, 0)),             # fc1 bias
            ],
            out_specs=[
                pl.BlockSpec((TB, MP, T), lambda i: (i, 0, 0)),
                pl.BlockSpec((TB, MP, 1), lambda i: (i, 0, 0)),
            ],
            scratch_shapes=[
                pltpu.VMEM((TB, MP, T + 2 * PAD), jnp.float32),      # zero-padded x halo
                pltpu.VMEM((NPF, TB), jnp.float32),                  # batch-tile features
            ]),
        compiler_params=pltpu.CompilerParams(
            dimension_semantics=("parallel",)),
    )(x3, wc, bc, vmask, wfc_k, bfc_k)

    out = out3[:B, :M][:, None]
    rate = rate3[:B, :M][:, None]
    return out, rate


def init_raw_params(key, M, T):
    """Deterministic synthetic parameters with the PyTorch module's shapes (eval mode)."""
    n_pool = (T - POOL_K) // POOL_S + 1
    ks = jax.random.split(key, 14)
    w1 = 0.1 * jax.random.normal(ks[0], (FT, KW), jnp.float32)      # Conv2d(1,FT,(1,17)) squeezed
    b1 = 0.1 * jax.random.normal(ks[1], (FT,), jnp.float32)
    g1 = 1.0 + 0.1 * jax.random.normal(ks[2], (FT,), jnp.float32)   # BN1 gamma/beta/running stats
    be1 = 0.1 * jax.random.normal(ks[3], (FT,), jnp.float32)
    rm1 = 0.1 * jax.random.normal(ks[4], (FT,), jnp.float32)
    rv1 = 0.5 + jax.random.uniform(ks[5], (FT,), jnp.float32)
    w2 = 0.1 * jax.random.normal(ks[6], (FS, FT, M), jnp.float32)   # Conv2d(FT,FS,(M,1)) squeezed
    b2 = 0.1 * jax.random.normal(ks[7], (FS,), jnp.float32)
    g2 = 1.0 + 0.1 * jax.random.normal(ks[8], (FS,), jnp.float32)   # BN2
    be2 = 0.1 * jax.random.normal(ks[9], (FS,), jnp.float32)
    rm2 = 0.1 * jax.random.normal(ks[10], (FS,), jnp.float32)
    rv2 = 0.5 + jax.random.uniform(ks[11], (FS,), jnp.float32)
    wfc = 0.1 * jax.random.normal(ks[12], (M, FS * n_pool), jnp.float32)  # Linear, torch flatten order
    bfc = 0.1 * jax.random.normal(ks[13], (M,), jnp.float32)
    return (w1, b1, g1, be1, rm1, rv1, w2, b2, g2, be2, rm2, rv2, wfc, bfc)


def prepare_kernel_params(raw, M, T):
    """Fold conv1/BN1/conv2/BN2 + pooling/flatten layout into kernel-ready tensors (f64 on host)."""
    (w1, b1, g1, be1, rm1, rv1, w2, b2, g2, be2, rm2, rv2, wfc, bfc) = [
        np.asarray(p, np.float64) for p in raw]
    n_pool = (T - POOL_K) // POOL_S + 1
    M_pad = ((M + 7) // 8) * 8

    s1 = g1 / np.sqrt(rv1); t1 = be1 - rm1 * s1          # eval-mode BN, eps=0 (module quirk)
    s2 = g2 / np.sqrt(rv2); t2 = be2 - rm2 * s2

    # Fused conv weight: Wc[fs, k, m] = s2[fs] * sum_ft w2[fs,ft,m]*s1[ft]*w1[ft,k]
    wc3 = np.einsum('s,sfm,f,fk->skm', s2, w2, s1, w1)
    wc = np.zeros((FS_PAD, KW, M_pad), np.float64)
    wc[:FS, :, :M] = wc3
    wc = wc.reshape(FS_PAD, KW * M_pad)                  # column index k*M_pad + m (im2col order)

    bc = np.zeros((FS_PAD, 1), np.float64)
    bc[:FS, 0] = s2 * (np.einsum('sfm,f->s', w2, s1 * b1 + t1) + b2) + t2

    # Overlapped avg-pool + flatten mask: row p*FS_PAD + fs carries 1/POOL_K inside window p.
    t_idx = np.arange(T)[None, :]
    p_idx = np.arange(n_pool)[:, None]
    win = ((t_idx >= p_idx * POOL_S) &
           (t_idx < p_idx * POOL_S + POOL_K)).astype(np.float64) / POOL_K      # (n_pool, T)
    vmask = np.repeat(win, FS_PAD, axis=0)                                     # (n_pool*FS_PAD, T)

    # fc1: torch flatten order (fs-major) -> kernel feature order p*FS_PAD + fs.
    wfc3 = wfc.reshape(M, FS, n_pool)
    wfc_k = np.zeros((M_pad, n_pool, FS_PAD), np.float64)
    wfc_k[:M, :, :FS] = np.transpose(wfc3, (0, 2, 1))
    wfc_k = wfc_k.reshape(M_pad, n_pool * FS_PAD)
    bfc_k = np.zeros((M_pad, 1), np.float64)
    bfc_k[:M, 0] = bfc

    f32 = lambda a: jnp.asarray(a, jnp.float32)
    return (f32(wc), f32(bc), f32(vmask), f32(wfc_k), f32(bfc_k))


def reference(x, raw):
    """Pure-JAX (lax conv) reference of the eval-mode forward, HIGHEST precision."""
    (w1, b1, g1, be1, rm1, rv1, w2, b2, g2, be2, rm2, rv2, wfc, bfc) = raw
    B, _, M, T = x.shape
    n_pool = (T - POOL_K) // POOL_S + 1
    s1 = g1 / jnp.sqrt(rv1); t1 = be1 - rm1 * s1
    s2 = g2 / jnp.sqrt(rv2); t2 = be2 - rm2 * s2
    hp = jax.lax.Precision.HIGHEST

    y1 = jax.lax.conv_general_dilated(x, w1[:, None, None, :], (1, 1),
                                      [(0, 0), (PAD, PAD)],
                                      dimension_numbers=("NCHW", "OIHW", "NCHW"),
                                      precision=hp)
    y1 = (y1 + b1[None, :, None, None]) * s1[None, :, None, None] + t1[None, :, None, None]
    y2 = jax.lax.conv_general_dilated(y1, w2[:, :, :, None], (1, 1), [(0, 0), (0, 0)],
                                      dimension_numbers=("NCHW", "OIHW", "NCHW"),
                                      precision=hp)
    y2 = (y2 + b2[None, :, None, None]) * s2[None, :, None, None] + t2[None, :, None, None]
    y2 = y2 ** 2
    pooled = jax.lax.reduce_window(y2, 0.0, jax.lax.add,
                                   (1, 1, 1, POOL_K), (1, 1, 1, POOL_S), "VALID") / POOL_K
    feat = jnp.log(jnp.maximum(pooled, EPSILON))           # (B, FS, 1, n_pool)
    flat = feat.reshape(B, FS * n_pool)                    # torch.flatten order (fs-major)
    scores = jnp.matmul(flat, wfc.T, precision=hp) + bfc[None, :]   # (B, M)
    sel = (scores >= 0.0).astype(jnp.float32)
    out = x * sel[:, None, :, None]
    rate = sel[:, None, :, None]
    return out, rate, scores


if __name__ == "__main__":
    B, M, T = 8, 8, 90          # (T - 75) % 15 == 0 so fc1 in_features is exact; n_pool = 2
    key = jax.random.PRNGKey(0)
    kx, kp = jax.random.split(key)
    x = jax.random.normal(kx, (B, 1, M, T), jnp.float32)
    raw = init_raw_params(kp, M, T)
    kparams = prepare_kernel_params(raw, M, T)

    out, rate = dynamic_selection_layer(x, kparams, tb=4)
    out = jax.block_until_ready(out)
    rate = jax.block_until_ready(rate)
    assert out.shape == (B, 1, M, T) and rate.shape == (B, 1, M, 1)

    ref_out, ref_rate, ref_scores = reference(x, raw)
    # The >=0 threshold is discontinuous: only compare electrodes whose reference score is
    # comfortably away from zero (different accumulation orders could flip the rest).
    scores_np = np.asarray(ref_scores)
    stable = np.abs(scores_np) > 1e-3                      # (B, M)
    assert stable.any()
    m_rate = stable[:, None, :, None]
    m_out = np.broadcast_to(m_rate, np.asarray(ref_out).shape)
    np.testing.assert_allclose(np.asarray(rate)[m_rate], np.asarray(ref_rate)[m_rate],
                               atol=1e-5, rtol=1e-5)
    np.testing.assert_allclose(np.asarray(out)[m_out], np.asarray(ref_out)[m_out],
                               atol=1e-4, rtol=1e-4)
    print("KERNEL_OK")
</pallas_src>

<mosaic_0001>
module attributes {stable_mosaic.version = 11 : i64} {
  func.func @_dsl_kernel(%arg0: i32, %arg1: memref<4x8x90xf32, #tpu.memory_space<vmem>>, %arg2: memref<16x136xf32, #tpu.memory_space<vmem>>, %arg3: memref<16x1xf32, #tpu.memory_space<vmem>>, %arg4: memref<32x90xf32, #tpu.memory_space<vmem>>, %arg5: memref<8x32xf32, #tpu.memory_space<vmem>>, %arg6: memref<8x1xf32, #tpu.memory_space<vmem>>, %arg7: memref<4x8x90xf32, #tpu.memory_space<vmem>>, %arg8: memref<4x8x1xf32, #tpu.memory_space<vmem>>, %arg9: memref<4x8x106xf32, #tpu.memory_space<vmem>>, %arg10: memref<32x4xf32, #tpu.memory_space<vmem>>) attributes {dimension_semantics = [#tpu.dimension_semantics<parallel>], iteration_bounds = array<i64: 2>, scalar_prefetch = 0 : i64, scratch_operands = 2 : i64, tpu.core_type = #tpu.core_type<tc>, window_params = [{transform_indices = @transform_0, window_bounds = array<i64: 4, 8, 90>}, {pipeline_mode = #tpu.pipeline_mode<synchronous>, transform_indices = @transform_1, window_bounds = array<i64: 16, 136>}, {pipeline_mode = #tpu.pipeline_mode<synchronous>, transform_indices = @transform_2, window_bounds = array<i64: 16, 1>}, {pipeline_mode = #tpu.pipeline_mode<synchronous>, transform_indices = @transform_3, window_bounds = array<i64: 32, 90>}, {pipeline_mode = #tpu.pipeline_mode<synchronous>, transform_indices = @transform_4, window_bounds = array<i64: 8, 32>}, {pipeline_mode = #tpu.pipeline_mode<synchronous>, transform_indices = @transform_5, window_bounds = array<i64: 8, 1>}, {transform_indices = @transform_6, window_bounds = array<i64: 4, 8, 90>}, {transform_indices = @transform_7, window_bounds = array<i64: 4, 8, 1>}]} {
    %cst = arith.constant 0.000000e+00 : f32
    %0 = vector.broadcast %cst : f32 to vector<4x8x8xf32>
    %c0 = arith.constant 0 : index
    %c0_0 = arith.constant 0 : index
    %c0_1 = arith.constant 0 : index
    %1 = vector.load %arg9[%c0, %c0_0, %c0_1] : memref<4x8x106xf32, #tpu.memory_space<vmem>>, vector<4x8x8xf32>
    tpu.vector_store %arg9[%c0, %c0_0, %c0_1], %0 {strides = array<i32>} : memref<4x8x106xf32, #tpu.memory_space<vmem>>, vector<4x8x8xf32>,
    %cst_2 = arith.constant 0.000000e+00 : f32
    %2 = vector.broadcast %cst_2 : f32 to vector<4x8x8xf32>
    %c0_3 = arith.constant 0 : index
    %c0_4 = arith.constant 0 : index
    %c98 = arith.constant 98 : index
    %3 = vector.load %arg9[%c0_3, %c0_4, %c98] : memref<4x8x106xf32, #tpu.memory_space<vmem>>, vector<4x8x8xf32>
    tpu.vector_store %arg9[%c0_3, %c0_4, %c98], %2 {strides = array<i32>} : memref<4x8x106xf32, #tpu.memory_space<vmem>>, vector<4x8x8xf32>,
    %c0_5 = arith.constant 0 : index
    %c0_6 = arith.constant 0 : index
    %c0_7 = arith.constant 0 : index
    %4 = vector.load %arg1[%c0_5, %c0_6, %c0_7] : memref<4x8x90xf32, #tpu.memory_space<vmem>>, vector<4x8x90xf32>
    %c0_8 = arith.constant 0 : index
    %c0_9 = arith.constant 0 : index
    %c8 = arith.constant 8 : index
    %5 = vector.load %arg9[%c0_8, %c0_9, %c8] : memref<4x8x106xf32, #tpu.memory_space<vmem>>, vector<4x8x90xf32>
    tpu.vector_store %arg9[%c0_8, %c0_9, %c8], %4 {strides = array<i32>} : memref<4x8x106xf32, #tpu.memory_space<vmem>>, vector<4x8x90xf32>,
    %c0_10 = arith.constant 0 : index
    %c0_11 = arith.constant 0 : index
    %6 = vector.load %arg2[%c0_10, %c0_11] : memref<16x136xf32, #tpu.memory_space<vmem>>, vector<16x136xf32>
    %c0_12 = arith.constant 0 : index
    %c0_13 = arith.constant 0 : index
    %7 = vector.load %arg3[%c0_12, %c0_13] : memref<16x1xf32, #tpu.memory_space<vmem>>, vector<16x1xf32>
    %c0_14 = arith.constant 0 : index
    %c0_15 = arith.constant 0 : index
    %8 = vector.load %arg4[%c0_14, %c0_15] : memref<32x90xf32, #tpu.memory_space<vmem>>, vector<32x90xf32>
    %c0_16 = arith.constant 0 : index
    %c0_17 = arith.constant 0 : index
    %c0_18 = arith.constant 0 : index
    %9 = vector.load %arg9[%c0_16, %c0_17, %c0_18] : memref<4x8x106xf32, #tpu.memory_space<vmem>>, vector<1x8x90xf32>
    %10 = vector.shape_cast %9 : vector<1x8x90xf32> to vector<8x90xf32>
    %c0_19 = arith.constant 0 : index
    %c0_20 = arith.constant 0 : index
    %c1 = arith.constant 1 : index
    %11 = vector.load %arg9[%c0_19, %c0_20, %c1] : memref<4x8x106xf32, #tpu.memory_space<vmem>>, vector<1x8x90xf32>
    %12 = vector.shape_cast %11 : vector<1x8x90xf32> to vector<8x90xf32>
    %c0_21 = arith.constant 0 : index
    %c0_22 = arith.constant 0 : index
    %c2 = arith.constant 2 : index
    %13 = vector.load %arg9[%c0_21, %c0_22, %c2] : memref<4x8x106xf32, #tpu.memory_space<vmem>>, vector<1x8x90xf32>
    %14 = vector.shape_cast %13 : vector<1x8x90xf32> to vector<8x90xf32>
    %c0_23 = arith.constant 0 : index
    %c0_24 = arith.constant 0 : index
    %c3 = arith.constant 3 : index
    %15 = vector.load %arg9[%c0_23, %c0_24, %c3] : memref<4x8x106xf32, #tpu.memory_space<vmem>>, vector<1x8x90xf32>
    %16 = vector.shape_cast %15 : vector<1x8x90xf32> to vector<8x90xf32>
    %c0_25 = arith.constant 0 : index
    %c0_26 = arith.constant 0 : index
    %c4 = arith.constant 4 : index
    %17 = vector.load %arg9[%c0_25, %c0_26, %c4] : memref<4x8x106xf32, #tpu.memory_space<vmem>>, vector<1x8x90xf32>
    %18 = vector.shape_cast %17 : vector<1x8x90xf32> to vector<8x90xf32>
    %c0_27 = arith.constant 0 : index
    %c0_28 = arith.constant 0 : index
    %c5 = arith.constant 5 : index
    %19 = vector.load %arg9[%c0_27, %c0_28, %c5] : memref<4x8x106xf32, #tpu.memory_space<vmem>>, vector<1x8x90xf32>
    %20 = vector.shape_cast %19 : vector<1x8x90xf32> to vector<8x90xf32>
    %c0_29 = arith.constant 0 : index
    %c0_30 = arith.constant 0 : index
    %c6 = arith.constant 6 : index
    %21 = vector.load %arg9[%c0_29, %c0_30, %c6] : memref<4x8x106xf32, #tpu.memory_space<vmem>>, vector<1x8x90xf32>
    %22 = vector.shape_cast %21 : vector<1x8x90xf32> to vector<8x90xf32>
    %c0_31 = arith.constant 0 : index
    %c0_32 = arith.constant 0 : index
    %c7 = arith.constant 7 : index
    %23 = vector.load %arg9[%c0_31, %c0_32, %c7] : memref<4x8x106xf32, #tpu.memory_space<vmem>>, vector<1x8x90xf32>
    %24 = vector.shape_cast %23 : vector<1x8x90xf32> to vector<8x90xf32>
    %c0_33 = arith.constant 0 : index
    %c0_34 = arith.constant 0 : index
    %c8_35 = arith.constant 8 : index
    %25 = vector.load %arg9[%c0_33, %c0_34, %c8_35] : memref<4x8x106xf32, #tpu.memory_space<vmem>>, vector<1x8x90xf32>
    %26 = vector.shape_cast %25 : vector<1x8x90xf32> to vector<8x90xf32>
    %c0_36 = arith.constant 0 : index
    %c0_37 = arith.constant 0 : index
    %c9 = arith.constant 9 : index
    %27 = vector.load %arg9[%c0_36, %c0_37, %c9] : memref<4x8x106xf32, #tpu.memory_space<vmem>>, vector<1x8x90xf32>
    %28 = vector.shape_cast %27 : vector<1x8x90xf32> to vector<8x90xf32>
    %c0_38 = arith.constant 0 : index
    %c0_39 = arith.constant 0 : index
    %c10 = arith.constant 10 : index
    %29 = vector.load %arg9[%c0_38, %c0_39, %c10] : memref<4x8x106xf32, #tpu.memory_space<vmem>>, vector<1x8x90xf32>
    %30 = vector.shape_cast %29 : vector<1x8x90xf32> to vector<8x90xf32>
    %c0_40 = arith.constant 0 : index
    %c0_41 = arith.constant 0 : index
    %c11 = arith.constant 11 : index
    %31 = vector.load %arg9[%c0_40, %c0_41, %c11] : memref<4x8x106xf32, #tpu.memory_space<vmem>>, vector<1x8x90xf32>
    %32 = vector.shape_cast %31 : vector<1x8x90xf32> to vector<8x90xf32>
    %c0_42 = arith.constant 0 : index
    %c0_43 = arith.constant 0 : index
    %c12 = arith.constant 12 : index
    %33 = vector.load %arg9[%c0_42, %c0_43, %c12] : memref<4x8x106xf32, #tpu.memory_space<vmem>>, vector<1x8x90xf32>
    %34 = vector.shape_cast %33 : vector<1x8x90xf32> to vector<8x90xf32>
    %c0_44 = arith.constant 0 : index
    %c0_45 = arith.constant 0 : index
    %c13 = arith.constant 13 : index
    %35 = vector.load %arg9[%c0_44, %c0_45, %c13] : memref<4x8x106xf32, #tpu.memory_space<vmem>>, vector<1x8x90xf32>
    %36 = vector.shape_cast %35 : vector<1x8x90xf32> to vector<8x90xf32>
    %c0_46 = arith.constant 0 : index
    %c0_47 = arith.constant 0 : index
    %c14 = arith.constant 14 : index
    %37 = vector.load %arg9[%c0_46, %c0_47, %c14] : memref<4x8x106xf32, #tpu.memory_space<vmem>>, vector<1x8x90xf32>
    %38 = vector.shape_cast %37 : vector<1x8x90xf32> to vector<8x90xf32>
    %c0_48 = arith.constant 0 : index
    %c0_49 = arith.constant 0 : index
    %c15 = arith.constant 15 : index
    %39 = vector.load %arg9[%c0_48, %c0_49, %c15] : memref<4x8x106xf32, #tpu.memory_space<vmem>>, vector<1x8x90xf32>
    %40 = vector.shape_cast %39 : vector<1x8x90xf32> to vector<8x90xf32>
    %c0_50 = arith.constant 0 : index
    %c0_51 = arith.constant 0 : index
    %c16 = arith.constant 16 : index
    %41 = vector.load %arg9[%c0_50, %c0_51, %c16] : memref<4x8x106xf32, #tpu.memory_space<vmem>>, vector<1x8x90xf32>
    %42 = vector.shape_cast %41 : vector<1x8x90xf32> to vector<8x90xf32>
    %43 = tpu.concatenate %10, %12, %14, %16, %18, %20, %22, %24, %26, %28, %30, %32, %34, %36, %38, %40 in 0 : vector<8x90xf32>, vector<8x90xf32>, vector<8x90xf32>, vector<8x90xf32>, vector<8x90xf32>, vector<8x90xf32>, vector<8x90xf32>, vector<8x90xf32>, vector<8x90xf32>, vector<8x90xf32>, vector<8x90xf32>, vector<8x90xf32>, vector<8x90xf32>, vector<8x90xf32>, vector<8x90xf32>, vector<8x90xf32> -> vector<128x90xf32>
    %44 = tpu.concatenate %43, %42 in 0 : vector<128x90xf32>, vector<8x90xf32> -> vector<136x90xf32>
    %cst_52 = arith.constant dense<0.000000e+00> : vector<16x90xf32>
    %45 = tpu.matmul %6, %44, %cst_52 {dimension_numbers = #tpu.dot_dimension_numbers<[1], [0], [0], [1], [0, 0, 1, 1], [], []>} : vector<16x136xf32>, vector<136x90xf32>, vector<16x90xf32> -> vector<16x90xf32>
    %46 = vector.broadcast %7 : vector<16x1xf32> to vector<16x90xf32>
    %47 = arith.addf %45, %46 : vector<16x90xf32>
    %48 = arith.mulf %47, %47 : vector<16x90xf32>
    %49 = tpu.concatenate %48, %48 in 0 : vector<16x90xf32>, vector<16x90xf32> -> vector<32x90xf32>
    %50 = arith.mulf %49, %8 : vector<32x90xf32>
    %cst_53 = arith.constant dense<0.000000e+00> : vector<32xf32>
    %51 = vector.multi_reduction <add>, %50, %cst_53 [1] : vector<32x90xf32> to vector<32xf32>
    %52 = vector.shape_cast %51 : vector<32xf32> to vector<32x1xf32>
    %cst_54 = arith.constant 1.000000e-10 : f32
    %53 = vector.broadcast %cst_54 : f32 to vector<32x1xf32>
    %54 = arith.maximumf %52, %53 : vector<32x1xf32>
    %55 = math.log %54 : vector<32x1xf32>
    %c0_55 = arith.constant 0 : index
    %c0_56 = arith.constant 0 : index
    %56 = vector.load %arg10[%c0_55, %c0_56] : memref<32x4xf32, #tpu.memory_space<vmem>>, vector<32x1xf32>
    tpu.vector_store %arg10[%c0_55, %c0_56], %55 {strides = array<i32>} : memref<32x4xf32, #tpu.memory_space<vmem>>, vector<32x1xf32>,
    %c1_57 = arith.constant 1 : index
    %c0_58 = arith.constant 0 : index
    %c0_59 = arith.constant 0 : index
    %57 = vector.load %arg9[%c1_57, %c0_58, %c0_59] : memref<4x8x106xf32, #tpu.memory_space<vmem>>, vector<1x8x90xf32>
    %58 = vector.shape_cast %57 : vector<1x8x90xf32> to vector<8x90xf32>
    %c1_60 = arith.constant 1 : index
    %c0_61 = arith.constant 0 : index
    %c1_62 = arith.constant 1 : index
    %59 = vector.load %arg9[%c1_60, %c0_61, %c1_62] : memref<4x8x106xf32, #tpu.memory_space<vmem>>, vector<1x8x90xf32>
    %60 = vector.shape_cast %59 : vector<1x8x90xf32> to vector<8x90xf32>
    %c1_63 = arith.constant 1 : index
    %c0_64 = arith.constant 0 : index
    %c2_65 = arith.constant 2 : index
    %61 = vector.load %arg9[%c1_63, %c0_64, %c2_65] : memref<4x8x106xf32, #tpu.memory_space<vmem>>, vector<1x8x90xf32>
    %62 = vector.shape_cast %61 : vector<1x8x90xf32> to vector<8x90xf32>
    %c1_66 = arith.constant 1 : index
    %c0_67 = arith.constant 0 : index
    %c3_68 = arith.constant 3 : index
    %63 = vector.load %arg9[%c1_66, %c0_67, %c3_68] : memref<4x8x106xf32, #tpu.memory_space<vmem>>, vector<1x8x90xf32>
    %64 = vector.shape_cast %63 : vector<1x8x90xf32> to vector<8x90xf32>
    %c1_69 = arith.constant 1 : index
    %c0_70 = arith.constant 0 : index
    %c4_71 = arith.constant 4 : index
    %65 = vector.load %arg9[%c1_69, %c0_70, %c4_71] : memref<4x8x106xf32, #tpu.memory_space<vmem>>, vector<1x8x90xf32>
    %66 = vector.shape_cast %65 : vector<1x8x90xf32> to vector<8x90xf32>
    %c1_72 = arith.constant 1 : index
    %c0_73 = arith.constant 0 : index
    %c5_74 = arith.constant 5 : index
    %67 = vector.load %arg9[%c1_72, %c0_73, %c5_74] : memref<4x8x106xf32, #tpu.memory_space<vmem>>, vector<1x8x90xf32>
    %68 = vector.shape_cast %67 : vector<1x8x90xf32> to vector<8x90xf32>
    %c1_75 = arith.constant 1 : index
    %c0_76 = arith.constant 0 : index
    %c6_77 = arith.constant 6 : index
    %69 = vector.load %arg9[%c1_75, %c0_76, %c6_77] : memref<4x8x106xf32, #tpu.memory_space<vmem>>, vector<1x8x90xf32>
    %70 = vector.shape_cast %69 : vector<1x8x90xf32> to vector<8x90xf32>
    %c1_78 = arith.constant 1 : index
    %c0_79 = arith.constant 0 : index
    %c7_80 = arith.constant 7 : index
    %71 = vector.load %arg9[%c1_78, %c0_79, %c7_80] : memref<4x8x106xf32, #tpu.memory_space<vmem>>, vector<1x8x90xf32>
    %72 = vector.shape_cast %71 : vector<1x8x90xf32> to vector<8x90xf32>
    %c1_81 = arith.constant 1 : index
    %c0_82 = arith.constant 0 : index
    %c8_83 = arith.constant 8 : index
    %73 = vector.load %arg9[%c1_81, %c0_82, %c8_83] : memref<4x8x106xf32, #tpu.memory_space<vmem>>, vector<1x8x90xf32>
    %74 = vector.shape_cast %73 : vector<1x8x90xf32> to vector<8x90xf32>
    %c1_84 = arith.constant 1 : index
    %c0_85 = arith.constant 0 : index
    %c9_86 = arith.constant 9 : index
    %75 = vector.load %arg9[%c1_84, %c0_85, %c9_86] : memref<4x8x106xf32, #tpu.memory_space<vmem>>, vector<1x8x90xf32>
    %76 = vector.shape_cast %75 : vector<1x8x90xf32> to vector<8x90xf32>
    %c1_87 = arith.constant 1 : index
    %c0_88 = arith.constant 0 : index
    %c10_89 = arith.constant 10 : index
    %77 = vector.load %arg9[%c1_87, %c0_88, %c10_89] : memref<4x8x106xf32, #tpu.memory_space<vmem>>, vector<1x8x90xf32>
    %78 = vector.shape_cast %77 : vector<1x8x90xf32> to vector<8x90xf32>
    %c1_90 = arith.constant 1 : index
    %c0_91 = arith.constant 0 : index
    %c11_92 = arith.constant 11 : index
    %79 = vector.load %arg9[%c1_90, %c0_91, %c11_92] : memref<4x8x106xf32, #tpu.memory_space<vmem>>, vector<1x8x90xf32>
    %80 = vector.shape_cast %79 : vector<1x8x90xf32> to vector<8x90xf32>
    %c1_93 = arith.constant 1 : index
    %c0_94 = arith.constant 0 : index
    %c12_95 = arith.constant 12 : index
    %81 = vector.load %arg9[%c1_93, %c0_94, %c12_95] : memref<4x8x106xf32, #tpu.memory_space<vmem>>, vector<1x8x90xf32>
    %82 = vector.shape_cast %81 : vector<1x8x90xf32> to vector<8x90xf32>
    %c1_96 = arith.constant 1 : index
    %c0_97 = arith.constant 0 : index
    %c13_98 = arith.constant 13 : index
    %83 = vector.load %arg9[%c1_96, %c0_97, %c13_98] : memref<4x8x106xf32, #tpu.memory_space<vmem>>, vector<1x8x90xf32>
    %84 = vector.shape_cast %83 : vector<1x8x90xf32> to vector<8x90xf32>
    %c1_99 = arith.constant 1 : index
    %c0_100 = arith.constant 0 : index
    %c14_101 = arith.constant 14 : index
    %85 = vector.load %arg9[%c1_99, %c0_100, %c14_101] : memref<4x8x106xf32, #tpu.memory_space<vmem>>, vector<1x8x90xf32>
    %86 = vector.shape_cast %85 : vector<1x8x90xf32> to vector<8x90xf32>
    %c1_102 = arith.constant 1 : index
    %c0_103 = arith.constant 0 : index
    %c15_104 = arith.constant 15 : index
    %87 = vector.load %arg9[%c1_102, %c0_103, %c15_104] : memref<4x8x106xf32, #tpu.memory_space<vmem>>, vector<1x8x90xf32>
    %88 = vector.shape_cast %87 : vector<1x8x90xf32> to vector<8x90xf32>
    %c1_105 = arith.constant 1 : index
    %c0_106 = arith.constant 0 : index
    %c16_107 = arith.constant 16 : index
    %89 = vector.load %arg9[%c1_105, %c0_106, %c16_107] : memref<4x8x106xf32, #tpu.memory_space<vmem>>, vector<1x8x90xf32>
    %90 = vector.shape_cast %89 : vector<1x8x90xf32> to vector<8x90xf32>
    %91 = tpu.concatenate %58, %60, %62, %64, %66, %68, %70, %72, %74, %76, %78, %80, %82, %84, %86, %88 in 0 : vector<8x90xf32>, vector<8x90xf32>, vector<8x90xf32>, vector<8x90xf32>, vector<8x90xf32>, vector<8x90xf32>, vector<8x90xf32>, vector<8x90xf32>, vector<8x90xf32>, vector<8x90xf32>, vector<8x90xf32>, vector<8x90xf32>, vector<8x90xf32>, vector<8x90xf32>, vector<8x90xf32>, vector<8x90xf32> -> vector<128x90xf32>
    %92 = tpu.concatenate %91, %90 in 0 : vector<128x90xf32>, vector<8x90xf32> -> vector<136x90xf32>
    %cst_108 = arith.constant dense<0.000000e+00> : vector<16x90xf32>
    %93 = tpu.matmul %6, %92, %cst_108 {dimension_numbers = #tpu.dot_dimension_numbers<[1], [0], [0], [1], [0, 0, 1, 1], [], []>} : vector<16x136xf32>, vector<136x90xf32>, vector<16x90xf32> -> vector<16x90xf32>
    %94 = vector.broadcast %7 : vector<16x1xf32> to vector<16x90xf32>
    %95 = arith.addf %93, %94 : vector<16x90xf32>
    %96 = arith.mulf %95, %95 : vector<16x90xf32>
    %97 = tpu.concatenate %96, %96 in 0 : vector<16x90xf32>, vector<16x90xf32> -> vector<32x90xf32>
    %98 = arith.mulf %97, %8 : vector<32x90xf32>
    %cst_109 = arith.constant dense<0.000000e+00> : vector<32xf32>
    %99 = vector.multi_reduction <add>, %98, %cst_109 [1] : vector<32x90xf32> to vector<32xf32>
    %100 = vector.shape_cast %99 : vector<32xf32> to vector<32x1xf32>
    %cst_110 = arith.constant 1.000000e-10 : f32
    %101 = vector.broadcast %cst_110 : f32 to vector<32x1xf32>
    %102 = arith.maximumf %100, %101 : vector<32x1xf32>
    %103 = math.log %102 : vector<32x1xf32>
    %c0_111 = arith.constant 0 : index
    %c1_112 = arith.constant 1 : index
    %104 = vector.load %arg10[%c0_111, %c1_112] : memref<32x4xf32, #tpu.memory_space<vmem>>, vector<32x1xf32>
    tpu.vector_store %arg10[%c0_111, %c1_112], %103 {strides = array<i32>} : memref<32x4xf32, #tpu.memory_space<vmem>>, vector<32x1xf32>,
    %c2_113 = arith.constant 2 : index
    %c0_114 = arith.constant 0 : index
    %c0_115 = arith.constant 0 : index
    %105 = vector.load %arg9[%c2_113, %c0_114, %c0_115] : memref<4x8x106xf32, #tpu.memory_space<vmem>>, vector<1x8x90xf32>
    %106 = vector.shape_cast %105 : vector<1x8x90xf32> to vector<8x90xf32>
    %c2_116 = arith.constant 2 : index
    %c0_117 = arith.constant 0 : index
    %c1_118 = arith.constant 1 : index
    %107 = vector.load %arg9[%c2_116, %c0_117, %c1_118] : memref<4x8x106xf32, #tpu.memory_space<vmem>>, vector<1x8x90xf32>
    %108 = vector.shape_cast %107 : vector<1x8x90xf32> to vector<8x90xf32>
    %c2_119 = arith.constant 2 : index
    %c0_120 = arith.constant 0 : index
    %c2_121 = arith.constant 2 : index
    %109 = vector.load %arg9[%c2_119, %c0_120, %c2_121] : memref<4x8x106xf32, #tpu.memory_space<vmem>>, vector<1x8x90xf32>
    %110 = vector.shape_cast %109 : vector<1x8x90xf32> to vector<8x90xf32>
    %c2_122 = arith.constant 2 : index
    %c0_123 = arith.constant 0 : index
    %c3_124 = arith.constant 3 : index
    %111 = vector.load %arg9[%c2_122, %c0_123, %c3_124] : memref<4x8x106xf32, #tpu.memory_space<vmem>>, vector<1x8x90xf32>
    %112 = vector.shape_cast %111 : vector<1x8x90xf32> to vector<8x90xf32>
    %c2_125 = arith.constant 2 : index
    %c0_126 = arith.constant 0 : index
    %c4_127 = arith.constant 4 : index
    %113 = vector.load %arg9[%c2_125, %c0_126, %c4_127] : memref<4x8x106xf32, #tpu.memory_space<vmem>>, vector<1x8x90xf32>
    %114 = vector.shape_cast %113 : vector<1x8x90xf32> to vector<8x90xf32>
    %c2_128 = arith.constant 2 : index
    %c0_129 = arith.constant 0 : index
    %c5_130 = arith.constant 5 : index
    %115 = vector.load %arg9[%c2_128, %c0_129, %c5_130] : memref<4x8x106xf32, #tpu.memory_space<vmem>>, vector<1x8x90xf32>
    %116 = vector.shape_cast %115 : vector<1x8x90xf32> to vector<8x90xf32>
    %c2_131 = arith.constant 2 : index
    %c0_132 = arith.constant 0 : index
    %c6_133 = arith.constant 6 : index
    %117 = vector.load %arg9[%c2_131, %c0_132, %c6_133] : memref<4x8x106xf32, #tpu.memory_space<vmem>>, vector<1x8x90xf32>
    %118 = vector.shape_cast %117 : vector<1x8x90xf32> to vector<8x90xf32>
    %c2_134 = arith.constant 2 : index
    %c0_135 = arith.constant 0 : index
    %c7_136 = arith.constant 7 : index
    %119 = vector.load %arg9[%c2_134, %c0_135, %c7_136] : memref<4x8x106xf32, #tpu.memory_space<vmem>>, vector<1x8x90xf32>
    %120 = vector.shape_cast %119 : vector<1x8x90xf32> to vector<8x90xf32>
    %c2_137 = arith.constant 2 : index
    %c0_138 = arith.constant 0 : index
    %c8_139 = arith.constant 8 : index
    %121 = vector.load %arg9[%c2_137, %c0_138, %c8_139] : memref<4x8x106xf32, #tpu.memory_space<vmem>>, vector<1x8x90xf32>
    %122 = vector.shape_cast %121 : vector<1x8x90xf32> to vector<8x90xf32>
    %c2_140 = arith.constant 2 : index
    %c0_141 = arith.constant 0 : index
    %c9_142 = arith.constant 9 : index
    %123 = vector.load %arg9[%c2_140, %c0_141, %c9_142] : memref<4x8x106xf32, #tpu.memory_space<vmem>>, vector<1x8x90xf32>
    %124 = vector.shape_cast %123 : vector<1x8x90xf32> to vector<8x90xf32>
    %c2_143 = arith.constant 2 : index
    %c0_144 = arith.constant 0 : index
    %c10_145 = arith.constant 10 : index
    %125 = vector.load %arg9[%c2_143, %c0_144, %c10_145] : memref<4x8x106xf32, #tpu.memory_space<vmem>>, vector<1x8x90xf32>
    %126 = vector.shape_cast %125 : vector<1x8x90xf32> to vector<8x90xf32>
    %c2_146 = arith.constant 2 : index
    %c0_147 = arith.constant 0 : index
    %c11_148 = arith.constant 11 : index
    %127 = vector.load %arg9[%c2_146, %c0_147, %c11_148] : memref<4x8x106xf32, #tpu.memory_space<vmem>>, vector<1x8x90xf32>
    %128 = vector.shape_cast %127 : vector<1x8x90xf32> to vector<8x90xf32>
    %c2_149 = arith.constant 2 : index
    %c0_150 = arith.constant 0 : index
    %c12_151 = arith.constant 12 : index
    %129 = vector.load %arg9[%c2_149, %c0_150, %c12_151] : memref<4x8x106xf32, #tpu.memory_space<vmem>>, vector<1x8x90xf32>
    %130 = vector.shape_cast %129 : vector<1x8x90xf32> to vector<8x90xf32>
    %c2_152 = arith.constant 2 : index
    %c0_153 = arith.constant 0 : index
    %c13_154 = arith.constant 13 : index
    %131 = vector.load %arg9[%c2_152, %c0_153, %c13_154] : memref<4x8x106xf32, #tpu.memory_space<vmem>>, vector<1x8x90xf32>
    %132 = vector.shape_cast %131 : vector<1x8x90xf32> to vector<8x90xf32>
    %c2_155 = arith.constant 2 : index
    %c0_156 = arith.constant 0 : index
    %c14_157 = arith.constant 14 : index
    %133 = vector.load %arg9[%c2_155, %c0_156, %c14_157] : memref<4x8x106xf32, #tpu.memory_space<vmem>>, vector<1x8x90xf32>
    %134 = vector.shape_cast %133 : vector<1x8x90xf32> to vector<8x90xf32>
    %c2_158 = arith.constant 2 : index
    %c0_159 = arith.constant 0 : index
    %c15_160 = arith.constant 15 : index
    %135 = vector.load %arg9[%c2_158, %c0_159, %c15_160] : memref<4x8x106xf32, #tpu.memory_space<vmem>>, vector<1x8x90xf32>
    %136 = vector.shape_cast %135 : vector<1x8x90xf32> to vector<8x90xf32>
    %c2_161 = arith.constant 2 : index
    %c0_162 = arith.constant 0 : index
    %c16_163 = arith.constant 16 : index
    %137 = vector.load %arg9[%c2_161, %c0_162, %c16_163] : memref<4x8x106xf32, #tpu.memory_space<vmem>>, vector<1x8x90xf32>
    %138 = vector.shape_cast %137 : vector<1x8x90xf32> to vector<8x90xf32>
    %139 = tpu.concatenate %106, %108, %110, %112, %114, %116, %118, %120, %122, %124, %126, %128, %130, %132, %134, %136 in 0 : vector<8x90xf32>, vector<8x90xf32>, vector<8x90xf32>, vector<8x90xf32>, vector<8x90xf32>, vector<8x90xf32>, vector<8x90xf32>, vector<8x90xf32>, vector<8x90xf32>, vector<8x90xf32>, vector<8x90xf32>, vector<8x90xf32>, vector<8x90xf32>, vector<8x90xf32>, vector<8x90xf32>, vector<8x90xf32> -> vector<128x90xf32>
    %140 = tpu.concatenate %139, %138 in 0 : vector<128x90xf32>, vector<8x90xf32> -> vector<136x90xf32>
    %cst_164 = arith.constant dense<0.000000e+00> : vector<16x90xf32>
    %141 = tpu.matmul %6, %140, %cst_164 {dimension_numbers = #tpu.dot_dimension_numbers<[1], [0], [0], [1], [0, 0, 1, 1], [], []>} : vector<16x136xf32>, vector<136x90xf32>, vector<16x90xf32> -> vector<16x90xf32>
    %142 = vector.broadcast %7 : vector<16x1xf32> to vector<16x90xf32>
    %143 = arith.addf %141, %142 : vector<16x90xf32>
    %144 = arith.mulf %143, %143 : vector<16x90xf32>
    %145 = tpu.concatenate %144, %144 in 0 : vector<16x90xf32>, vector<16x90xf32> -> vector<32x90xf32>
    %146 = arith.mulf %145, %8 : vector<32x90xf32>
    %cst_165 = arith.constant dense<0.000000e+00> : vector<32xf32>
    %147 = vector.multi_reduction <add>, %146, %cst_165 [1] : vector<32x90xf32> to vector<32xf32>
    %148 = vector.shape_cast %147 : vector<32xf32> to vector<32x1xf32>
    %cst_166 = arith.constant 1.000000e-10 : f32
    %149 = vector.broadcast %cst_166 : f32 to vector<32x1xf32>
    %150 = arith.maximumf %148, %149 : vector<32x1xf32>
    %151 = math.log %150 : vector<32x1xf32>
    %c0_167 = arith.constant 0 : index
    %c2_168 = arith.constant 2 : index
    %152 = vector.load %arg10[%c0_167, %c2_168] : memref<32x4xf32, #tpu.memory_space<vmem>>, vector<32x1xf32>
    tpu.vector_store %arg10[%c0_167, %c2_168], %151 {strides = array<i32>} : memref<32x4xf32, #tpu.memory_space<vmem>>, vector<32x1xf32>,
    %c3_169 = arith.constant 3 : index
    %c0_170 = arith.constant 0 : index
    %c0_171 = arith.constant 0 : index
    %153 = vector.load %arg9[%c3_169, %c0_170, %c0_171] : memref<4x8x106xf32, #tpu.memory_space<vmem>>, vector<1x8x90xf32>
    %154 = vector.shape_cast %153 : vector<1x8x90xf32> to vector<8x90xf32>
    %c3_172 = arith.constant 3 : index
    %c0_173 = arith.constant 0 : index
    %c1_174 = arith.constant 1 : index
    %155 = vector.load %arg9[%c3_172, %c0_173, %c1_174] : memref<4x8x106xf32, #tpu.memory_space<vmem>>, vector<1x8x90xf32>
    %156 = vector.shape_cast %155 : vector<1x8x90xf32> to vector<8x90xf32>
    %c3_175 = arith.constant 3 : index
    %c0_176 = arith.constant 0 : index
    %c2_177 = arith.constant 2 : index
    %157 = vector.load %arg9[%c3_175, %c0_176, %c2_177] : memref<4x8x106xf32, #tpu.memory_space<vmem>>, vector<1x8x90xf32>
    %158 = vector.shape_cast %157 : vector<1x8x90xf32> to vector<8x90xf32>
    %c3_178 = arith.constant 3 : index
    %c0_179 = arith.constant 0 : index
    %c3_180 = arith.constant 3 : index
    %159 = vector.load %arg9[%c3_178, %c0_179, %c3_180] : memref<4x8x106xf32, #tpu.memory_space<vmem>>, vector<1x8x90xf32>
    %160 = vector.shape_cast %159 : vector<1x8x90xf32> to vector<8x90xf32>
    %c3_181 = arith.constant 3 : index
    %c0_182 = arith.constant 0 : index
    %c4_183 = arith.constant 4 : index
    %161 = vector.load %arg9[%c3_181, %c0_182, %c4_183] : memref<4x8x106xf32, #tpu.memory_space<vmem>>, vector<1x8x90xf32>
    %162 = vector.shape_cast %161 : vector<1x8x90xf32> to vector<8x90xf32>
    %c3_184 = arith.constant 3 : index
    %c0_185 = arith.constant 0 : index
    %c5_186 = arith.constant 5 : index
    %163 = vector.load %arg9[%c3_184, %c0_185, %c5_186] : memref<4x8x106xf32, #tpu.memory_space<vmem>>, vector<1x8x90xf32>
    %164 = vector.shape_cast %163 : vector<1x8x90xf32> to vector<8x90xf32>
    %c3_187 = arith.constant 3 : index
    %c0_188 = arith.constant 0 : index
    %c6_189 = arith.constant 6 : index
    %165 = vector.load %arg9[%c3_187, %c0_188, %c6_189] : memref<4x8x106xf32, #tpu.memory_space<vmem>>, vector<1x8x90xf32>
    %166 = vector.shape_cast %165 : vector<1x8x90xf32> to vector<8x90xf32>
    %c3_190 = arith.constant 3 : index
    %c0_191 = arith.constant 0 : index
    %c7_192 = arith.constant 7 : index
    %167 = vector.load %arg9[%c3_190, %c0_191, %c7_192] : memref<4x8x106xf32, #tpu.memory_space<vmem>>, vector<1x8x90xf32>
    %168 = vector.shape_cast %167 : vector<1x8x90xf32> to vector<8x90xf32>
    %c3_193 = arith.constant 3 : index
    %c0_194 = arith.constant 0 : index
    %c8_195 = arith.constant 8 : index
    %169 = vector.load %arg9[%c3_193, %c0_194, %c8_195] : memref<4x8x106xf32, #tpu.memory_space<vmem>>, vector<1x8x90xf32>
    %170 = vector.shape_cast %169 : vector<1x8x90xf32> to vector<8x90xf32>
    %c3_196 = arith.constant 3 : index
    %c0_197 = arith.constant 0 : index
    %c9_198 = arith.constant 9 : index
    %171 = vector.load %arg9[%c3_196, %c0_197, %c9_198] : memref<4x8x106xf32, #tpu.memory_space<vmem>>, vector<1x8x90xf32>
    %172 = vector.shape_cast %171 : vector<1x8x90xf32> to vector<8x90xf32>
    %c3_199 = arith.constant 3 : index
    %c0_200 = arith.constant 0 : index
    %c10_201 = arith.constant 10 : index
    %173 = vector.load %arg9[%c3_199, %c0_200, %c10_201] : memref<4x8x106xf32, #tpu.memory_space<vmem>>, vector<1x8x90xf32>
    %174 = vector.shape_cast %173 : vector<1x8x90xf32> to vector<8x90xf32>
    %c3_202 = arith.constant 3 : index
    %c0_203 = arith.constant 0 : index
    %c11_204 = arith.constant 11 : index
    %175 = vector.load %arg9[%c3_202, %c0_203, %c11_204] : memref<4x8x106xf32, #tpu.memory_space<vmem>>, vector<1x8x90xf32>
    %176 = vector.shape_cast %175 : vector<1x8x90xf32> to vector<8x90xf32>
    %c3_205 = arith.constant 3 : index
    %c0_206 = arith.constant 0 : index
    %c12_207 = arith.constant 12 : index
    %177 = vector.load %arg9[%c3_205, %c0_206, %c12_207] : memref<4x8x106xf32, #tpu.memory_space<vmem>>, vector<1x8x90xf32>
    %178 = vector.shape_cast %177 : vector<1x8x90xf32> to vector<8x90xf32>
    %c3_208 = arith.constant 3 : index
    %c0_209 = arith.constant 0 : index
    %c13_210 = arith.constant 13 : index
    %179 = vector.load %arg9[%c3_208, %c0_209, %c13_210] : memref<4x8x106xf32, #tpu.memory_space<vmem>>, vector<1x8x90xf32>
    %180 = vector.shape_cast %179 : vector<1x8x90xf32> to vector<8x90xf32>
    %c3_211 = arith.constant 3 : index
    %c0_212 = arith.constant 0 : index
    %c14_213 = arith.constant 14 : index
    %181 = vector.load %arg9[%c3_211, %c0_212, %c14_213] : memref<4x8x106xf32, #tpu.memory_space<vmem>>, vector<1x8x90xf32>
    %182 = vector.shape_cast %181 : vector<1x8x90xf32> to vector<8x90xf32>
    %c3_214 = arith.constant 3 : index
    %c0_215 = arith.constant 0 : index
    %c15_216 = arith.constant 15 : index
    %183 = vector.load %arg9[%c3_214, %c0_215, %c15_216] : memref<4x8x106xf32, #tpu.memory_space<vmem>>, vector<1x8x90xf32>
    %184 = vector.shape_cast %183 : vector<1x8x90xf32> to vector<8x90xf32>
    %c3_217 = arith.constant 3 : index
    %c0_218 = arith.constant 0 : index
    %c16_219 = arith.constant 16 : index
    %185 = vector.load %arg9[%c3_217, %c0_218, %c16_219] : memref<4x8x106xf32, #tpu.memory_space<vmem>>, vector<1x8x90xf32>
    %186 = vector.shape_cast %185 : vector<1x8x90xf32> to vector<8x90xf32>
    %187 = tpu.concatenate %154, %156, %158, %160, %162, %164, %166, %168, %170, %172, %174, %176, %178, %180, %182, %184 in 0 : vector<8x90xf32>, vector<8x90xf32>, vector<8x90xf32>, vector<8x90xf32>, vector<8x90xf32>, vector<8x90xf32>, vector<8x90xf32>, vector<8x90xf32>, vector<8x90xf32>, vector<8x90xf32>, vector<8x90xf32>, vector<8x90xf32>, vector<8x90xf32>, vector<8x90xf32>, vector<8x90xf32>, vector<8x90xf32> -> vector<128x90xf32>
    %188 = tpu.concatenate %187, %186 in 0 : vector<128x90xf32>, vector<8x90xf32> -> vector<136x90xf32>
    %cst_220 = arith.constant dense<0.000000e+00> : vector<16x90xf32>
    %189 = tpu.matmul %6, %188, %cst_220 {dimension_numbers = #tpu.dot_dimension_numbers<[1], [0], [0], [1], [0, 0, 1, 1], [], []>} : vector<16x136xf32>, vector<136x90xf32>, vector<16x90xf32> -> vector<16x90xf32>
    %190 = vector.broadcast %7 : vector<16x1xf32> to vector<16x90xf32>
    %191 = arith.addf %189, %190 : vector<16x90xf32>
    %192 = arith.mulf %191, %191 : vector<16x90xf32>
    %193 = tpu.concatenate %192, %192 in 0 : vector<16x90xf32>, vector<16x90xf32> -> vector<32x90xf32>
    %194 = arith.mulf %193, %8 : vector<32x90xf32>
    %cst_221 = arith.constant dense<0.000000e+00> : vector<32xf32>
    %195 = vector.multi_reduction <add>, %194, %cst_221 [1] : vector<32x90xf32> to vector<32xf32>
    %196 = vector.shape_cast %195 : vector<32xf32> to vector<32x1xf32>
    %cst_222 = arith.constant 1.000000e-10 : f32
    %197 = vector.broadcast %cst_222 : f32 to vector<32x1xf32>
    %198 = arith.maximumf %196, %197 : vector<32x1xf32>
    %199 = math.log %198 : vector<32x1xf32>
    %c0_223 = arith.constant 0 : index
    %c3_224 = arith.constant 3 : index
    %200 = vector.load %arg10[%c0_223, %c3_224] : memref<32x4xf32, #tpu.memory_space<vmem>>, vector<32x1xf32>
    tpu.vector_store %arg10[%c0_223, %c3_224], %199 {strides = array<i32>} : memref<32x4xf32, #tpu.memory_space<vmem>>, vector<32x1xf32>,
    %c0_225 = arith.constant 0 : index
    %c0_226 = arith.constant 0 : index
    %201 = vector.load %arg5[%c0_225, %c0_226] : memref<8x32xf32, #tpu.memory_space<vmem>>, vector<8x32xf32>
    %c0_227 = arith.constant 0 : index
    %c0_228 = arith.constant 0 : index
    %202 = vector.load %arg10[%c0_227, %c0_228] : memref<32x4xf32, #tpu.memory_space<vmem>>, vector<32x4xf32>
    %cst_229 = arith.constant dense<0.000000e+00> : vector<8x4xf32>
    %203 = tpu.matmul %201, %202, %cst_229 {dimension_numbers = #tpu.dot_dimension_numbers<[1], [0], [0], [1], [0, 0, 1, 1], [], []>} : vector<8x32xf32>, vector<32x4xf32>, vector<8x4xf32> -> vector<8x4xf32>
    %c0_230 = arith.constant 0 : index
    %c0_231 = arith.constant 0 : index
    %204 = vector.load %arg6[%c0_230, %c0_231] : memref<8x1xf32, #tpu.memory_space<vmem>>, vector<8x1xf32>
    %205 = vector.broadcast %204 : vector<8x1xf32> to vector<8x4xf32>
    %206 = arith.addf %203, %205 : vector<8x4xf32>
    %cst_232 = arith.constant 0.000000e+00 : f32
    %207 = vector.broadcast %cst_232 : f32 to vector<8x4xf32>
    %208 = arith.cmpf oge, %206, %207 : vector<8x4xf32>
    %209 = arith.extui %208 : vector<8x4xi1> to vector<8x4xi32>
    %210 = arith.sitofp %209 : vector<8x4xi32> to vector<8x4xf32>
    %211 = vector.extract_strided_slice %210 {offsets = [0, 0], sizes = [8, 1], strides = [1, 1]} : vector<8x4xf32> to vector<8x1xf32>
    %c0_233 = arith.constant 0 : index
    %c0_234 = arith.constant 0 : index
    %c0_235 = arith.constant 0 : index
    %212 = vector.load %arg8[%c0_233, %c0_234, %c0_235] : memref<4x8x1xf32, #tpu.memory_space<vmem>>, vector<1x8x1xf32>
    %213 = vector.shape_cast %212 : vector<1x8x1xf32> to vector<8x1xf32>
    %214 = vector.shape_cast %211 : vector<8x1xf32> to vector<1x8x1xf32>
    tpu.vector_store %arg8[%c0_233, %c0_234, %c0_235], %214 {strides = array<i32>} : memref<4x8x1xf32, #tpu.memory_space<vmem>>, vector<1x8x1xf32>,
    %c0_236 = arith.constant 0 : index
    %c0_237 = arith.constant 0 : index
    %c0_238 = arith.constant 0 : index
    %215 = vector.load %arg1[%c0_236, %c0_237, %c0_238] : memref<4x8x90xf32, #tpu.memory_space<vmem>>, vector<1x8x90xf32>
    %216 = vector.shape_cast %215 : vector<1x8x90xf32> to vector<8x90xf32>
    %217 = vector.broadcast %211 : vector<8x1xf32> to vector<8x90xf32>
    %218 = arith.mulf %216, %217 : vector<8x90xf32>
    %c0_239 = arith.constant 0 : index
    %c0_240 = arith.constant 0 : index
    %c0_241 = arith.constant 0 : index
    %219 = vector.load %arg7[%c0_239, %c0_240, %c0_241] : memref<4x8x90xf32, #tpu.memory_space<vmem>>, vector<1x8x90xf32>
    %220 = vector.shape_cast %219 : vector<1x8x90xf32> to vector<8x90xf32>
    %221 = vector.shape_cast %218 : vector<8x90xf32> to vector<1x8x90xf32>
    tpu.vector_store %arg7[%c0_239, %c0_240, %c0_241], %221 {strides = array<i32>} : memref<4x8x90xf32, #tpu.memory_space<vmem>>, vector<1x8x90xf32>,
    %222 = vector.extract_strided_slice %210 {offsets = [0, 1], sizes = [8, 1], strides = [1, 1]} : vector<8x4xf32> to vector<8x1xf32>
    %c1_242 = arith.constant 1 : index
    %c0_243 = arith.constant 0 : index
    %c0_244 = arith.constant 0 : index
    %223 = vector.load %arg8[%c1_242, %c0_243, %c0_244] : memref<4x8x1xf32, #tpu.memory_space<vmem>>, vector<1x8x1xf32>
    %224 = vector.shape_cast %223 : vector<1x8x1xf32> to vector<8x1xf32>
    %225 = vector.shape_cast %222 : vector<8x1xf32> to vector<1x8x1xf32>
    tpu.vector_store %arg8[%c1_242, %c0_243, %c0_244], %225 {strides = array<i32>} : memref<4x8x1xf32, #tpu.memory_space<vmem>>, vector<1x8x1xf32>,
    %c1_245 = arith.constant 1 : index
    %c0_246 = arith.constant 0 : index
    %c0_247 = arith.constant 0 : index
    %226 = vector.load %arg1[%c1_245, %c0_246, %c0_247] : memref<4x8x90xf32, #tpu.memory_space<vmem>>, vector<1x8x90xf32>
    %227 = vector.shape_cast %226 : vector<1x8x90xf32> to vector<8x90xf32>
    %228 = vector.broadcast %222 : vector<8x1xf32> to vector<8x90xf32>
    %229 = arith.mulf %227, %228 : vector<8x90xf32>
    %c1_248 = arith.constant 1 : index
    %c0_249 = arith.constant 0 : index
    %c0_250 = arith.constant 0 : index
    %230 = vector.load %arg7[%c1_248, %c0_249, %c0_250] : memref<4x8x90xf32, #tpu.memory_space<vmem>>, vector<1x8x90xf32>
    %231 = vector.shape_cast %230 : vector<1x8x90xf32> to vector<8x90xf32>
    %232 = vector.shape_cast %229 : vector<8x90xf32> to vector<1x8x90xf32>
    tpu.vector_store %arg7[%c1_248, %c0_249, %c0_250], %232 {strides = array<i32>} : memref<4x8x90xf32, #tpu.memory_space<vmem>>, vector<1x8x90xf32>,
    %233 = vector.extract_strided_slice %210 {offsets = [0, 2], sizes = [8, 1], strides = [1, 1]} : vector<8x4xf32> to vector<8x1xf32>
    %c2_251 = arith.constant 2 : index
    %c0_252 = arith.constant 0 : index
    %c0_253 = arith.constant 0 : index
    %234 = vector.load %arg8[%c2_251, %c0_252, %c0_253] : memref<4x8x1xf32, #tpu.memory_space<vmem>>, vector<1x8x1xf32>
    %235 = vector.shape_cast %234 : vector<1x8x1xf32> to vector<8x1xf32>
    %236 = vector.shape_cast %233 : vector<8x1xf32> to vector<1x8x1xf32>
    tpu.vector_store %arg8[%c2_251, %c0_252, %c0_253], %236 {strides = array<i32>} : memref<4x8x1xf32, #tpu.memory_space<vmem>>, vector<1x8x1xf32>,
    %c2_254 = arith.constant 2 : index
    %c0_255 = arith.constant 0 : index
    %c0_256 = arith.constant 0 : index
    %237 = vector.load %arg1[%c2_254, %c0_255, %c0_256] : memref<4x8x90xf32, #tpu.memory_space<vmem>>, vector<1x8x90xf32>
    %238 = vector.shape_cast %237 : vector<1x8x90xf32> to vector<8x90xf32>
    %239 = vector.broadcast %233 : vector<8x1xf32> to vector<8x90xf32>
    %240 = arith.mulf %238, %239 : vector<8x90xf32>
    %c2_257 = arith.constant 2 : index
    %c0_258 = arith.constant 0 : index
    %c0_259 = arith.constant 0 : index
    %241 = vector.load %arg7[%c2_257, %c0_258, %c0_259] : memref<4x8x90xf32, #tpu.memory_space<vmem>>, vector<1x8x90xf32>
    %242 = vector.shape_cast %241 : vector<1x8x90xf32> to vector<8x90xf32>
    %243 = vector.shape_cast %240 : vector<8x90xf32> to vector<1x8x90xf32>
    tpu.vector_store %arg7[%c2_257, %c0_258, %c0_259], %243 {strides = array<i32>} : memref<4x8x90xf32, #tpu.memory_space<vmem>>, vector<1x8x90xf32>,
    %244 = vector.extract_strided_slice %210 {offsets = [0, 3], sizes = [8, 1], strides = [1, 1]} : vector<8x4xf32> to vector<8x1xf32>
    %c3_260 = arith.constant 3 : index
    %c0_261 = arith.constant 0 : index
    %c0_262 = arith.constant 0 : index
    %245 = vector.load %arg8[%c3_260, %c0_261, %c0_262] : memref<4x8x1xf32, #tpu.memory_space<vmem>>, vector<1x8x1xf32>
    %246 = vector.shape_cast %245 : vector<1x8x1xf32> to vector<8x1xf32>
    %247 = vector.shape_cast %244 : vector<8x1xf32> to vector<1x8x1xf32>
    tpu.vector_store %arg8[%c3_260, %c0_261, %c0_262], %247 {strides = array<i32>} : memref<4x8x1xf32, #tpu.memory_space<vmem>>, vector<1x8x1xf32>,
    %c3_263 = arith.constant 3 : index
    %c0_264 = arith.constant 0 : index
    %c0_265 = arith.constant 0 : index
    %248 = vector.load %arg1[%c3_263, %c0_264, %c0_265] : memref<4x8x90xf32, #tpu.memory_space<vmem>>, vector<1x8x90xf32>
    %249 = vector.shape_cast %248 : vector<1x8x90xf32> to vector<8x90xf32>
    %250 = vector.broadcast %244 : vector<8x1xf32> to vector<8x90xf32>
    %251 = arith.mulf %249, %250 : vector<8x90xf32>
    %c3_266 = arith.constant 3 : index
    %c0_267 = arith.constant 0 : index
    %c0_268 = arith.constant 0 : index
    %252 = vector.load %arg7[%c3_266, %c0_267, %c0_268] : memref<4x8x90xf32, #tpu.memory_space<vmem>>, vector<1x8x90xf32>
    %253 = vector.shape_cast %252 : vector<1x8x90xf32> to vector<8x90xf32>
    %254 = vector.shape_cast %251 : vector<8x90xf32> to vector<1x8x90xf32>
    tpu.vector_store %arg7[%c3_266, %c0_267, %c0_268], %254 {strides = array<i32>} : memref<4x8x90xf32, #tpu.memory_space<vmem>>, vector<1x8x90xf32>,
    return
  }
  func.func @transform_0(%arg0: i32) -> (i32, i32, i32) {
    %c0_i32 = arith.constant 0 : i32
    %c0_i32_0 = arith.constant 0 : i32
    %c0_i32_1 = arith.constant 0 : i32
    return %arg0, %c0_i32, %c0_i32_0 : i32, i32, i32
  }
  func.func @transform_1(%arg0: i32) -> (i32, i32) {
    %c0_i32 = arith.constant 0 : i32
    %c0_i32_0 = arith.constant 0 : i32
    %c0_i32_1 = arith.constant 0 : i32
    return %c0_i32, %c0_i32_0 : i32, i32
  }
  func.func @transform_2(%arg0: i32) -> (i32, i32) {
    %c0_i32 = arith.constant 0 : i32
    %c0_i32_0 = arith.constant 0 : i32
    %c0_i32_1 = arith.constant 0 : i32
    return %c0_i32, %c0_i32_0 : i32, i32
  }
  func.func @transform_3(%arg0: i32) -> (i32, i32) {
    %c0_i32 = arith.constant 0 : i32
    %c0_i32_0 = arith.constant 0 : i32
    %c0_i32_1 = arith.constant 0 : i32
    return %c0_i32, %c0_i32_0 : i32, i32
  }
  func.func @transform_4(%arg0: i32) -> (i32, i32) {
    %c0_i32 = arith.constant 0 : i32
    %c0_i32_0 = arith.constant 0 : i32
    %c0_i32_1 = arith.constant 0 : i32
    return %c0_i32, %c0_i32_0 : i32, i32
  }
  func.func @transform_5(%arg0: i32) -> (i32, i32) {
    %c0_i32 = arith.constant 0 : i32
    %c0_i32_0 = arith.constant 0 : i32
    %c0_i32_1 = arith.constant 0 : i32
    return %c0_i32, %c0_i32_0 : i32, i32
  }
  func.func @transform_6(%arg0: i32) -> (i32, i32, i32) {
    %c0_i32 = arith.constant 0 : i32
    %c0_i32_0 = arith.constant 0 : i32
    %c0_i32_1 = arith.constant 0 : i32
    return %arg0, %c0_i32, %c0_i32_0 : i32, i32, i32
  }
  func.func @transform_7(%arg0: i32) -> (i32, i32, i32) {
    %c0_i32 = arith.constant 0 : i32
    %c0_i32_0 = arith.constant 0 : i32
    %c0_i32_1 = arith.constant 0 : i32
    return %arg0, %c0_i32, %c0_i32_0 : i32, i32, i32
  }
}

</mosaic_0001>

<bundles_post_ra>
// kernel: tpu_custom_call.1
= control target key start
LH: loop header
LB: loop body
LE: loop exit
PB: predicated region body
PF: predicated region fallthrough
CT: control target
= control target key end

     0   :  { %s2357_s0 = inlined_call_operand.hbm [shape: f32[8,8,90], index: 0, kind: input, shape index: {}]   ;;  %s2358_s1 = inlined_call_operand.hbm [shape: f32[16,136], index: 1, kind: input, shape index: {}]   ;;  %s2359_s2 = inlined_call_operand.vmem [shape: f32[16,1], index: 2, kind: input, shape index: {}]   ;;  %s2360_s3 = inlined_call_operand.vmem [shape: f32[32,90], index: 3, kind: input, shape index: {}]   ;;  %s2361_s4 = inlined_call_operand.vmem [shape: f32[8,32], index: 4, kind: input, shape index: {}]   ;;  %s2362_s5 = inlined_call_operand.vmem [shape: f32[8,1], index: 5, kind: input, shape index: {}]   ;;  %s2363_s6 = inlined_call_operand.hbm [shape: f32[8,8,90], index: 6, kind: output, shape index: {0}]   ;;  %s2364_s7 = inlined_call_operand.vmem [shape: f32[8,8,1], index: 7, kind: output, shape index: {1}]  }
   0x1   :  { %2376 = sst [smem:[#allocation14_spill]] %s2357_s0 }
   0x2   :  { %2377 = sst [smem:[#allocation15_spill]] %s2358_s1 }
   0x3   :  { %13 = vsyncpa [#allocation5], 0 }
   0x4   :  { %15 = vsyncpa [#allocation5 + $0x1], 0 }
   0x5   :  { %16 = vsyncpa [#allocation8], 0 }
   0x6   :  { %17 = vsyncpa [#allocation6], 0 }
   0x7   :  { %19 = vsyncpa [#allocation6 + $0x1], 0  ;;  %s1936_s24 = smov 0   ;;  %s1938_s25 = smov 0  }
   0x8   :  { %s1940_s26 = smov 0   ;;  %s1942_s27 = smov 0  }
   0x9 LB: > { %s1957_s28 = sadd.s32 4294967295, %s1862_s27   ;;  %s1303_s29 = sadd.s32 4294967294, %s1862_s27   ;;  %s1862_s27 = sphi %s1942_s27, %s2406_s27   ;;  %s1858_s26 = sphi %s1940_s26, %s2405_s26   ;;  %s1854_s25 = sphi %s1938_s25, %s2404_s25   ;;  %s1850_s24 = sphi %s1936_s24, %s2403_s24  }
   0xa   : > { %p45_p0 = scmp.ne.s32.totalorder %s1854_s25, %s1850_s24  ;;  %p2365_p1 = scmp.eq.s32.totalorder %s1957_s28, 0 }
   0xb   : > { %p180_p3 = scmp.eq.s32.totalorder %s1303_s29, 1  ;;  %p1304_p5 = scmp.ge.s32.totalorder %s1862_s27, 1 }
   0xc   : > { %p1966_p4 = por %p2365_p1, %p45_p0  ;;  %p213_p7 = scmp.lt.s32.totalorder %s1862_s27, 3 }
   0xd   : > { %p1971_p6 = por %p180_p3, %p45_p0  ;;  %s1864_s10 = smov [#allocation7]  }
   0xe   : > { %s2378_s30 = scalar_select %p1966_p4, 1, 0 }
   0xf   : > { %s2379_s8 = scalar_select %p1971_p6, 1, 0 }
  0x10   : > { %p1976_p8 = pnand %p1304_p5, %p213_p7  ;;  %s225_s11 = sshll.u32 %s1864_s10, 4  ;;  %s1980_s11 = int_to_ptr.vmem [resolvable:$true] %s225_s11 }
  0x11   : > { %s1992_s13 = sadd.s32 1, %s1862_s27   ;;  %s32_s14 = sadd.s32 1, %s1858_s26 }
  0x12   : > { %s2380_s9 = scalar_select %p1976_p8, 1, 0 }
  0x13   : > { %p1468_p9 = pneg %p1976_p8  ;;  %s29_s15 = ssub.s32 %s1862_s27, %s1992_s13 }
  0x14   : > { %s2382_s1 = sld [smem:[#allocation15_spill]] }
  0x15   : > { %p1987_p11 = pnand %p1468_p9, %p2365_p1 }
  0x17   : > { %p1736_p13 = pneg %p1987_p11 }
  0x1a   : > { %s1734_s18 = scalar_lea.hbm %s2382_s1, 512 }
  0x1b   : > { %p1735_p12 = scmp.ne.s32.totalorder %s2382_s1, %s1734_s18  ;;  %p1741_p5 = scmp.lt.u32.totalorder %s1734_s18, %s2382_s1 }
  0x1d   : > { %p1737_p0 = pnand %p1736_p13, %p1735_p12 }
  0x1f   : > { %p1738_p3 = pneg %p1737_p0 }
  0x21   : > { %p1743_p7 = pnand %p1741_p5, %p1738_p3 }
  0x23   : > { %1746 = shalt.err (!%p1743_p7)
}
  0x24   : > { %s1747_s23 = scalar_lea.vmem %s1980_s11, 512  ;;  %p1755_p2 = scmp.lt.s32.totalorder %s1980_s11, %s1980_s11 }
  0x25   : > { %p1748_p9 = scmp.ne.s32.totalorder %s1980_s11, %s1747_s23  ;;  %p1756_p6 = scmp.lt.s32.totalorder %s1747_s23, %s1747_s23 }
  0x27   : > { %p1750_p10 = pnand %p1748_p9, %p1736_p13  ;;  %p1757_p4 = por %p1756_p6, %p1755_p2 }
  0x29   : > { %p1751_p1 = pneg %p1750_p10 }
  0x2b   : > { %p1758_p8 = pnand %p1757_p4, %p1751_p1 }
  0x2d   : > { %1761 = shalt.err (!%p1758_p8)
}
  0x2e   : > { %s1865_s29 = smov 256   ;;  %s1866_s10 = smov 16  }
  0x2f   : > { %1471 = dma.hbm_to_vmem [thread:$0]  (!%p1987_p11), %s2382_s1, 512, %s1980_s11, [#allocation8], %s1865_s29, %s1865_s29, %s1866_s10  }
  0x30   : > { %p30_p2 = scmp.eq.s32.totalorder %s29_s15, 0  ;;  %p39_p1 = scmp.ne.s32.totalorder %s1858_s26, %s1854_s25 }
  0x31   : > { %p40_p4 = scmp.eq.s32.totalorder %s1862_s27, 0  ;;  %p1481_p6 = scmp.lt.s32.totalorder %s1862_s27, 2 }
  0x32   : > { %s2023_s18 = scalar_select %p30_p2, %s1858_s26, %s32_s14  }
  0x33   : > { %p41_p8 = por %p40_p4, %p39_p1  ;;  %p2384_p10 = scmp.eq.s32.totalorder %s1957_s28, 1 }
  0x34   : > { %2383 = sst [smem:[#allocation13_spill]] %s2023_s18  ;;  %s251_s20 = sand.u32 1, %s1858_s26  }
  0x35   : > { %p2027_p12 = por %p2384_p10, %p39_p1  ;;  %s1340_s21 = sshll.u32 %s1862_s27, 9 }
  0x36   : > { %s1307_s22 = sshll.u32 %s251_s20, 5  ;;  %s2386_s0 = sld [smem:[#allocation14_spill]] }
  0x37   : > { %s255_s11 = scalar_lea.vmem [#allocation4], %s1307_s22  ;;  %p2038_p11 = pnand %p1481_p6, %p41_p8 }
  0x38   : > { %s262_s14 = sshll.u32 %s255_s11, 4  ;;  %s2044_s29 = scalar_lea.sflag [#allocation5], %s251_s20  ;;  %s2042_s14 = int_to_ptr.vmem [resolvable:$true] %s262_s14 }
  0x39   : > { %p1764_p0 = pneg %p2038_p11 }
  0x3c   : > { %s2036_s16 = scalar_lea.hbm %s2386_s0, %s1340_s21  ;;  %s1767_s22 = scalar_lea.hbm %s2386_s0, 1024 }
  0x3d   : > { %s1762_s10 = scalar_lea.hbm %s2036_s16, 512  ;;  %p1768_p7 = scmp.lt.u32.totalorder %s2036_s16, %s2386_s0 }
  0x3e   : > { %p1763_p13 = scmp.ne.s32.totalorder %s2036_s16, %s1762_s10  ;;  %p1769_p9 = scmp.lt.u32.totalorder %s1767_s22, %s1762_s10 }
  0x3f   : > { %p1771_p1 = scmp.lt.u32.totalorder %s1762_s10, %s2036_s16 }
  0x40   : > { %p1765_p3 = pnand %p1764_p0, %p1763_p13  ;;  %p1770_p2 = por %p1769_p9, %p1768_p7 }
  0x42   : > { %p1766_p5 = pneg %p1765_p3  ;;  %p1772_p4 = por %p1771_p1, %p1770_p2 }
  0x44   : > { %p1773_p6 = pnand %p1772_p4, %p1766_p5 }
  0x46   : > { %1776 = shalt.err (!%p1773_p6)
}
  0x47   : > { %s1777_s20 = scalar_lea.vmem %s2042_s14, 512  ;;  %s1867_s11 = smov [#allocation4]  }
  0x48   : > { %p1778_p8 = scmp.ne.s32.totalorder %s2042_s14, %s1777_s20  ;;  %s1782_s17 = sshll.u32 %s1867_s11, 4  ;;  %s1783_s17 = int_to_ptr.vmem [resolvable:$false] %s1782_s17 }
  0x49   : > { %s1784_s21 = scalar_lea.vmem %s1783_s17, 1024  ;;  %p1785_p3 = scmp.lt.s32.totalorder %s2042_s14, %s1783_s17 }
  0x4a   : > { %p1780_p10 = pnand %p1778_p8, %p1764_p0  ;;  %p1786_p7 = scmp.lt.s32.totalorder %s1784_s21, %s1777_s20 }
  0x4c   : > { %p1781_p13 = pneg %p1780_p10  ;;  %p1787_p9 = por %p1786_p7, %p1785_p3 }
  0x4e   : > { %p1788_p2 = pnand %p1787_p9, %p1781_p13 }
  0x50   : > { %1791 = shalt.err (!%p1788_p2)
}
  0x51   : > { %s1868_s10 = smov 128   ;;  %s1869_s22 = smov 8  }
  0x52   : > { %1475 = dma.hbm_to_vmem [thread:$0]  (!%p2038_p11), %s2036_s16, 512, %s2042_s14, %s2044_s29, %s1868_s10, %s1868_s10, %s1869_s22  }
  0x53   : > { %p2388_p0 = scmp.ne.s32.totalorder %s2380_s9, 0 }
  0x54   : > { %s2075_s12 = sand.u32 (!%p2388_p0), 1, %s1854_s25   ;;  %p2389_p5 = scmp.ne.s32.totalorder (!%p2388_p0), %s2378_s30, 0 }
  0x55   : > { %274 = sbr.rel (%p2388_p0) target bundleno = 1196 (0x4ac), region = 44  ;;  %s2369_s23 = sshll.u32 (!%p2388_p0), %s2075_s12, 5 }
  0x56   : > { %s277_s20 = scalar_lea.sflag (!%p2388_p0), [#allocation5], %s2075_s12  ;;  %s2081_s11 = scalar_lea.vmem (!%p2388_p0), [#allocation4], %s2369_s23 }
  0x5c   : > { %1837 = dma.done.wait (%p2389_p5), %s277_s20, 512  }
  0x5d   : > { %1839 = vsyncadd (%p2389_p5), %s277_s20, 4294966784  ;;  %p2390_p11 = scmp.eq.s32.totalorder %s1957_s28, 0 }
  0x5f   : > { %1841 = dma.done.wait (%p2390_p11), [#allocation8], 512   ;;  %p2391_p1 = pmov %p2390_p11 }
  0x60   : > { %vm328_vm0 = vcmask 64512   ;;  %vm333_vm1 = vcmask 868112   ;;  %v1870_v0 = vmov 0.0   ;;  %v338_v1 = vld [vmem:[%s2081_s11] sm:$0xff]  ;;  %v340_v2 = vld [vmem:[%s2081_s11 + $0x10] sm:$0xff]  ;;  %s2368_s30 = smov 8  }
  0x61   : > { %1843 = vsyncadd (%p2391_p1), [#allocation8], 4294966784  ;;  %329 = vst.msk [vmem:[#allocation2] sm:$0xff] %vm328_vm0, %v1870_v0  ;;  %346 = vrot.lane.b32.xlu0 %v338_v1, %s2368_s30  ;;  %350 = vrot.lane.b32.xlu1 %v340_v2, %s2368_s30  ;;  %v339_v3 = vld [vmem:[%s2081_s11 + $0x8] sm:$0xff]  ;;  %v341_v4 = vld [vmem:[%s2081_s11 + $0x18] sm:$0xff]  ;;  %vm358_vm2 = vcmask 801856  }
  0x62   : > { %330 = vst.msk [vmem:[#allocation2 + $0x8] sm:$0xff] %vm328_vm0, %v1870_v0  ;;  %331 = vst.msk [vmem:[#allocation2 + $0x10] sm:$0xff] %vm328_vm0, %v1870_v0  ;;  %v1872_v7 = vmov 0.0|0.0   ;;  %s1873_s9 = smov 126   ;;  %s2375_s16 = smov 127   ;;  %v2129_v13 = vld [vmem:[#allocation7 + $0x8] sm:$0xff] }
  0x63   : > { %332 = vst.msk [vmem:[#allocation2 + $0x18] sm:$0xff] %vm328_vm0, %v1870_v0  ;;  %1358 = vmatprep.subr.bf16.mxu0 %v1872_v7  ;;  %1382 = vmatprep.subr.bf16.mxu1 %v1872_v7  ;;  %s2371_s14 = smov 124   ;;  %s1876_s15 = smov 125   ;;  %v1889_v17 = vmov 0   ;;  %v367_v18 = vld [vmem:[%s2359_s2] sm:$0xff]  ;;  %v368_v19 = vld [vmem:[%s2359_s2 + $0x8] sm:$0xff] }
  0x64   : > { %334 = vst.msk [vmem:[#allocation2] sm:$0xff] %vm333_vm1, %v1870_v0  ;;  %335 = vst.msk [vmem:[#allocation2 + $0x8] sm:$0xff] %vm333_vm1, %v1870_v0  ;;  %s2370_s29 = smov 122   ;;  %s1878_s17 = smov 123   ;;  %1316 = vmatprep.mubr.msk.f32.mxu0 %vm328_vm0, %v2129_v13  ;;  %1318 = vmatprep.mubr.msk.f32.mxu1 %vm328_vm0, %v2129_v13  ;;  %vm520_vm3 = vcmask 736256   ;;  %vm1890_vm4 = vmmov 0  }
  0x65   : > { %336 = vst.msk [vmem:[#allocation2 + $0x10] sm:$0xff] %vm333_vm1, %v1870_v0  ;;  %337 = vst.msk [vmem:[#allocation2 + $0x18] sm:$0xff] %vm333_vm1, %v1870_v0  ;;  %348 = vrot.lane.b32.xlu0 %v339_v3, %s2368_s30  ;;  %352 = vrot.lane.b32.xlu1 %v341_v4, %s2368_s30  ;;  %s2374_s21 = smov 120   ;;  %s1880_s10 = smov 121   ;;  %vm545_vm5 = vcmask 7168   ;;  %vm706_vm6 = vcmask 15368  }
  0x66   : > { %s2372_s22 = smov 118   ;;  %s1882_s20 = smov 119   ;;  %1696 = vset.pattern.permute.xlu0 %v1889_v17  ;;  %1697 = vset.pattern.permute.xlu1 %v1889_v17  ;;  %vm867_vm7 = vcmask 23568   ;;  %vm1028_vm8 = vcmask 31768   ;;  %vm1044_vm9 = vcmask 261120  }
  0x67   : > { %s2373_s30 = smov 116   ;;  %s1884_s23 = smov 117  }
  0x68   : > { %s2393_s0 = smov 122   ;;  %s2394_s1 = smov 120  }
  0x69   : > { %s2395_s18 = smov 118  }
  0xd3   : > { %v347_v5 = vpop.permute.xlu0 %346  ;;  %v351_v6 = vpop.permute.xlu1 %350 }
  0xd4   : > { %359 = vst.msk [vmem:[#allocation2] sm:$0xff] %vm358_vm2, %v347_v5  ;;  %361 = vst.msk [vmem:[#allocation2 + $0x10] sm:$0xff] %vm358_vm2, %v351_v6 }
  0xd7   : > { %v349_v8 = vpop.permute.xlu0 %348  ;;  %v353_v9 = vpop.permute.xlu1 %352 }
  0xd8   : > { %360 = vst.msk [vmem:[#allocation2 + $0x8] sm:$0xff] %vm358_vm2, %v349_v8  ;;  %362 = vst.msk [vmem:[#allocation2 + $0x18] sm:$0xff] %vm358_vm2, %v353_v9 }
  0xdb   : > { %v2113_v10 = vld [vmem:[#allocation2] sm:$0xff]  ;;  %v2135_v14 = vld [vmem:[#allocation2 + $0x10] sm:$0xff] }
  0xdf   : > { %v2115_v11 = vld [vmem:[#allocation2 + $0x8] sm:$0xff]  ;;  %v2137_v15 = vld [vmem:[#allocation2 + $0x18] sm:$0xff] }
  0xe0   : > { %v1551_v12 = vpack.i.bf16 %v2115_v11, %v2113_v10  ;;  %v1621_v16 = vpack.i.bf16 %v2137_v15, %v2135_v14 }
  0xe2   : > { %1552 = vrot.lane.b32.xlu1 %v1551_v12, %s1873_s9  ;;  %1547 = vrot.lane.b32.xlu0 %v1551_v12, %s2375_s16 }
  0xe6   : > { %1562 = vrot.lane.b32.xlu1 %v1551_v12, %s2371_s14  ;;  %1557 = vrot.lane.b32.xlu0 %v1551_v12, %s1876_s15  ;;  %s1886_s14 = smov 115  }
  0xea   : > { %1572 = vrot.lane.b32.xlu1 %v1551_v12, %s2370_s29  ;;  %1567 = vrot.lane.b32.xlu0 %v1551_v12, %s1878_s17  ;;  %s1885_s29 = smov 114  }
  0xee   : > { %1582 = vrot.lane.b32.xlu1 %v1551_v12, %s2374_s21  ;;  %1577 = vrot.lane.b32.xlu0 %v1551_v12, %s1880_s10  ;;  %s2392_s21 = smov 124  }
  0xf2   : > { %1592 = vrot.lane.b32.xlu1 %v1551_v12, %s2372_s22  ;;  %1587 = vrot.lane.b32.xlu0 %v1551_v12, %s1882_s20  ;;  %s1887_s22 = smov 112  }
  0xf6   : > { %1602 = vrot.lane.b32.xlu1 %v1551_v12, %s2373_s30  ;;  %1597 = vrot.lane.b32.xlu0 %v1551_v12, %s1884_s23  ;;  %s1888_s30 = smov 113  }
  0xfa   : > { %1612 = vrot.lane.b32.xlu1 %v1551_v12, %s1885_s29  ;;  %1607 = vrot.lane.b32.xlu0 %v1551_v12, %s1886_s14 }
  0xfe   : > { %420 = vrot.lane.b32.xlu1 %v2113_v10, %s1887_s22  ;;  %1617 = vrot.lane.b32.xlu0 %v1551_v12, %s1888_s30 }
 0x102   : > { %598 = vrot.lane.b32.xlu1 %v2115_v11, %s1887_s22  ;;  %1622 = vrot.lane.b32.xlu0 %v1621_v16, %s2375_s16  ;;  %s2396_s16 = smov 116  }
 0x106   : > { %1632 = vrot.lane.b32.xlu1 %v1621_v16, %s1876_s15  ;;  %1627 = vrot.lane.b32.xlu0 %v1621_v16, %s1873_s9 }
 0x10a   : > { %1642 = vrot.lane.b32.xlu1 %v1621_v16, %s1878_s17  ;;  %1637 = vrot.lane.b32.xlu0 %v1621_v16, %s2392_s21  ;;  %s1173_s21 = scalar_lea.sflag [#allocation6], %s2075_s12 }
 0x10e   : > { %1652 = vrot.lane.b32.xlu1 %v1621_v16, %s1880_s10  ;;  %1647 = vrot.lane.b32.xlu0 %v1621_v16, %s2393_s0  ;;  %s1341_s10 = sshll.u32 %s1957_s28, 9 }
 0x10f   : > { %s2311_s17 = scalar_lea.hbm %s2363_s6, %s1341_s10 }
 0x112   : > { %1662 = vrot.lane.b32.xlu1 %v1621_v16, %s1882_s20  ;;  %1657 = vrot.lane.b32.xlu0 %v1621_v16, %s2394_s1  ;;  %s1314_s1 = sshll.u32 %s1957_s28, 2  ;;  %s1894_s28 = smov [#allocation9]  }
 0x113   : > { %p323_p4 = scmp.lt.s32.totalorder %s1314_s1, 7 }
 0x115   : > { %s2408_s1 = smov (!%p323_p4, %s1314_s1), 7 }
 0x116   : > { %1672 = vrot.lane.b32.xlu1 %v1621_v16, %s1884_s23  ;;  %1667 = vrot.lane.b32.xlu0 %v1621_v16, %s2395_s18  ;;  %s1315_s18 = sshll.u32 %s2408_s1, 3 }
 0x11a   : > { %1682 = vrot.lane.b32.xlu1 %v1621_v16, %s1886_s14  ;;  %1677 = vrot.lane.b32.xlu0 %v1621_v16, %s2396_s16  ;;  %s326_s16 = scalar_lea.vmem %s2364_s7, %s1315_s18  ;;  %s2397_s14 = smov 127  }
 0x11e   : > { %1692 = vrot.lane.b32.xlu1 %v1621_v16, %s1888_s30  ;;  %1687 = vrot.lane.b32.xlu0 %v1621_v16, %s1885_s29 }
 0x122   : > { %920 = vrot.lane.b32.xlu1 %v2137_v15, %s1887_s22  ;;  %759 = vrot.lane.b32.xlu0 %v2135_v14, %s1887_s22 }
 0x126   : > { %425 = vperm.xlu0 %1696, %v367_v18   ;;  %430 = vperm.xlu1 %1697, %v368_v19  }
 0x154   : > { %v1553_v20 = vpop.permute.xlu1 %1552  ;;  %v1548_v21 = vpop.permute.xlu0 %1547 }
 0x155   : > { %v1550_v22 = vunpack.i.h.bf16 %v1548_v21  ;;  %v1549_v23 = vunpack.i.l.bf16 %v1548_v21  ;;  %v1555_v28 = vunpack.i.h.bf16 %v1553_v20  ;;  %v1554_v29 = vunpack.i.l.bf16 %v1553_v20 }
 0x157   : > { %v1359_v24 = vpack.c.bf16 %v1549_v23, %v2113_v10  ;;  %v1383_v25 = vpack.c.bf16 %v1550_v22, %v2115_v11 }
 0x158   : > { %v1563_v26 = vpop.permute.xlu1 %1562  ;;  %v1558_v27 = vpop.permute.xlu0 %1557 }
 0x159   : > { %v1560_v30 = vunpack.i.h.bf16 %v1558_v27  ;;  %v1559_v31 = vunpack.i.l.bf16 %v1558_v27  ;;  %1360 = vmatpush1.bf16.msra.mxu0 %v1359_v24  ;;  %1384 = vmatpush1.bf16.msra.mxu1 %v1383_v25  ;;  %v1565_v36 = vunpack.i.h.bf16 %v1563_v26  ;;  %v1564_v37 = vunpack.i.l.bf16 %v1563_v26  ;;  %v2179_v27 = vld [vmem:[#allocation7] sm:$0xff] }
 0x15a   : > { %1361 = vmatprep.subr.bf16.mxu0 %v1872_v7  ;;  %1385 = vmatprep.subr.bf16.mxu1 %v1872_v7 }
 0x15b   : > { %v1386_v32 = vpack.c.bf16 %v1560_v30, %v1555_v28  ;;  %v1362_v33 = vpack.c.bf16 %v1559_v31, %v1554_v29 }
 0x15c   : > { %v1573_v34 = vpop.permute.xlu1 %1572  ;;  %v1568_v35 = vpop.permute.xlu0 %1567 }
 0x15d   : > { %v1570_v38 = vunpack.i.h.bf16 %v1568_v35  ;;  %v1569_v39 = vunpack.i.l.bf16 %v1568_v35  ;;  %1363 = vmatpush1.bf16.msra.mxu0 %v1362_v33  ;;  %1387 = vmatpush1.bf16.msra.mxu1 %v1386_v32  ;;  %v1575_v44 = vunpack.i.h.bf16 %v1573_v34  ;;  %v1574_v45 = vunpack.i.l.bf16 %v1573_v34 }
 0x15e   : > { %1364 = vmatprep.subr.bf16.mxu0 %v1872_v7  ;;  %1388 = vmatprep.subr.bf16.mxu1 %v1872_v7 }
 0x15f   : > { %v1389_v40 = vpack.c.bf16 %v1570_v38, %v1565_v36  ;;  %v1365_v41 = vpack.c.bf16 %v1569_v39, %v1564_v37  ;;  %v2187_v36 = vld [vmem:[#allocation7 + $0x18] sm:$0xff]  ;;  %v2189_v37 = vld [vmem:[#allocation7 + $0x10] sm:$0xff] }
 0x160   : > { %v1583_v42 = vpop.permute.xlu1 %1582  ;;  %v1578_v43 = vpop.permute.xlu0 %1577 }
 0x161   : > { %v1580_v46 = vunpack.i.h.bf16 %v1578_v43  ;;  %v1579_v47 = vunpack.i.l.bf16 %v1578_v43  ;;  %1366 = vmatpush1.bf16.msra.mxu0 %v1365_v41  ;;  %1390 = vmatpush1.bf16.msra.mxu1 %v1389_v40  ;;  %v1585_v52 = vunpack.i.h.bf16 %v1583_v42  ;;  %v1584_v53 = vunpack.i.l.bf16 %v1583_v42 }
 0x162   : > { %1367 = vmatprep.subr.bf16.mxu0 %v1872_v7  ;;  %1391 = vmatprep.subr.bf16.mxu1 %v1872_v7 }
 0x163   : > { %v1392_v48 = vpack.c.bf16 %v1580_v46, %v1575_v44  ;;  %v1368_v49 = vpack.c.bf16 %v1579_v47, %v1574_v45 }
 0x164   : > { %v1593_v50 = vpop.permute.xlu1 %1592  ;;  %v1588_v51 = vpop.permute.xlu0 %1587 }
 0x165   : > { %v1590_v54 = vunpack.i.h.bf16 %v1588_v51  ;;  %v1589_v55 = vunpack.i.l.bf16 %v1588_v51  ;;  %1369 = vmatpush1.bf16.msra.mxu0 %v1368_v49  ;;  %1393 = vmatpush1.bf16.msra.mxu1 %v1392_v48  ;;  %v1595_v60 = vunpack.i.h.bf16 %v1593_v50  ;;  %v1594_v61 = vunpack.i.l.bf16 %v1593_v50 }
 0x166   : > { %1370 = vmatprep.subr.bf16.mxu0 %v1872_v7  ;;  %1394 = vmatprep.subr.bf16.mxu1 %v1872_v7 }
 0x167   : > { %v1395_v56 = vpack.c.bf16 %v1590_v54, %v1585_v52  ;;  %v1371_v57 = vpack.c.bf16 %v1589_v55, %v1584_v53 }
 0x168   : > { %v1603_v58 = vpop.permute.xlu1 %1602  ;;  %v1598_v59 = vpop.permute.xlu0 %1597 }
 0x169   : > { %v1600_v62 = vunpack.i.h.bf16 %v1598_v59  ;;  %v1599_v63 = vunpack.i.l.bf16 %v1598_v59  ;;  %1372 = vmatpush1.bf16.msra.mxu0 %v1371_v57  ;;  %1396 = vmatpush1.bf16.msra.mxu1 %v1395_v56  ;;  %v1605_v5 = vunpack.i.h.bf16 %v1603_v58  ;;  %v1604_v6 = vunpack.i.l.bf16 %v1603_v58 }
 0x16a   : > { %1373 = vmatprep.subr.bf16.mxu0 %v1872_v7  ;;  %1397 = vmatprep.subr.bf16.mxu1 %v1872_v7 }
 0x16b   : > { %v1398_v1 = vpack.c.bf16 %v1600_v62, %v1595_v60  ;;  %v1374_v2 = vpack.c.bf16 %v1599_v63, %v1594_v61 }
 0x16c   : > { %v1613_v3 = vpop.permute.xlu1 %1612  ;;  %v1608_v4 = vpop.permute.xlu0 %1607 }
 0x16d   : > { %v1610_v8 = vunpack.i.h.bf16 %v1608_v4  ;;  %v1609_v9 = vunpack.i.l.bf16 %v1608_v4  ;;  %1375 = vmatpush1.bf16.msra.mxu0 %v1374_v2  ;;  %1399 = vmatpush1.bf16.msra.mxu1 %v1398_v1  ;;  %v1615_v17 = vunpack.i.h.bf16 %v1613_v3  ;;  %v1614_v18 = vunpack.i.l.bf16 %v1613_v3 }
 0x16e   : > { %1376 = vmatprep.subr.bf16.mxu0 %v1872_v7  ;;  %1400 = vmatprep.subr.bf16.mxu1 %v1872_v7 }
 0x16f   : > { %v1401_v10 = vpack.c.bf16 %v1610_v8, %v1605_v5  ;;  %v1377_v11 = vpack.c.bf16 %v1609_v9, %v1604_v6 }
 0x170   : > { %v421_v12 = vpop.permute.xlu1 %420  ;;  %v1618_v16 = vpop.permute.xlu0 %1617 }
 0x171   : > { %v1620_v19 = vunpack.i.h.bf16 %v1618_v16  ;;  %v1619_v20 = vunpack.i.l.bf16 %v1618_v16  ;;  %1378 = vmatpush1.bf16.msra.mxu0 %v1377_v11  ;;  %1402 = vmatpush1.bf16.msra.mxu1 %v1401_v10 }
 0x172   : > { %1379 = vmatprep.subr.bf16.mxu0 %v1872_v7  ;;  %1403 = vmatprep.subr.bf16.mxu1 %v1872_v7 }
 0x173   : > { %v1404_v21 = vpack.c.bf16 %v1620_v19, %v1615_v17  ;;  %v1380_v22 = vpack.c.bf16 %v1619_v20, %v1614_v18 }
 0x174   : > { %v599_v23 = vpop.permute.xlu1 %598  ;;  %v1623_v24 = vpop.permute.xlu0 %1622 }
 0x175   : > { %v1625_v25 = vunpack.i.h.bf16 %v1623_v24  ;;  %v1624_v26 = vunpack.i.l.bf16 %v1623_v24  ;;  %1381 = vmatpush1.bf16.msra.mxu0 %v1380_v22  ;;  %1405 = vmatpush1.bf16.msra.mxu1 %v1404_v21 }
 0x176   : > { %471 = vmatprep.subr.mxu0 %v1870_v0  ;;  %633 = vmatprep.subr.mxu1 %v1870_v0 }
 0x177   : > { %v1431_v30 = vpack.c.bf16 %v1625_v25, %v2137_v15  ;;  %v1407_v31 = vpack.c.bf16 %v1624_v26, %v2135_v14 }
 0x178   : > { %v1633_v28 = vpop.permute.xlu1 %1632  ;;  %v1628_v29 = vpop.permute.xlu0 %1627 }
 0x179   : > { %472 = vmatpush1.msra.mxu0 %v421_v12  ;;  %634 = vmatpush1.msra.mxu1 %v599_v23  ;;  %v1635_v32 = vunpack.i.h.bf16 %v1633_v28  ;;  %v1634_v33 = vunpack.i.l.bf16 %v1633_v28  ;;  %v1630_v34 = vunpack.i.h.bf16 %v1628_v29  ;;  %v1629_v35 = vunpack.i.l.bf16 %v1628_v29 }
 0x17a   : > { %504 = vmatmul.mubr.f32.vlgmr.msra.gmra.mrb[0].mxu0 %v2179_v27  ;;  %666 = vmatmul.mubr.f32.vlgmr.msra.gmra.mrb[0].mxu1 %v2179_v27 }
 0x17b   : > { %1406 = vmatprep.subr.bf16.mxu0 %v1872_v7  ;;  %1430 = vmatprep.subr.bf16.mxu1 %v1872_v7  ;;  %v1434_v42 = vpack.c.bf16 %v1635_v32, %v1630_v34  ;;  %v1410_v43 = vpack.c.bf16 %v1634_v33, %v1629_v35 }
 0x17c   : > { %1408 = vmatpush1.bf16.msra.mxu0 %v1407_v31  ;;  %1432 = vmatpush1.bf16.msra.mxu1 %v1431_v30  ;;  %v1643_v15 = vpop.permute.xlu1 %1642  ;;  %v1638_v14 = vpop.permute.xlu0 %1637 }
 0x17d   : > { %v1645_v38 = vunpack.i.h.bf16 %v1643_v15  ;;  %v1644_v39 = vunpack.i.l.bf16 %v1643_v15  ;;  %v1640_v40 = vunpack.i.h.bf16 %v1638_v14  ;;  %v1639_v41 = vunpack.i.l.bf16 %v1638_v14  ;;  %1409 = vmatprep.subr.bf16.mxu0 %v1872_v7  ;;  %1433 = vmatprep.subr.bf16.mxu1 %v1872_v7 }
 0x17e   : > { %1319 = vmatprep.mubr.msk.f32.mxu1 %vm328_vm0, %v2187_v36  ;;  %1317 = vmatprep.mubr.msk.f32.mxu0 %vm328_vm0, %v2187_v36 }
 0x17f   : > { %671 = vmatmul.mubr.f32.gmra.mrb[2].mxu1 %v2189_v37  ;;  %509 = vmatmul.mubr.f32.gmra.mrb[2].mxu0 %v2189_v37  ;;  %v1437_v46 = vpack.c.bf16 %v1645_v38, %v1640_v40  ;;  %v1413_v47 = vpack.c.bf16 %v1644_v39, %v1639_v41  ;;  %v2232_v38 = vld [vmem:[%s2360_s3 + $0x10] sm:$0xff] }
 0x180   : > { %1411 = vmatpush1.bf16.msra.mxu0 %v1410_v43  ;;  %1435 = vmatpush1.bf16.msra.mxu1 %v1434_v42  ;;  %v1653_v44 = vpop.permute.xlu1 %1652  ;;  %v1648_v45 = vpop.permute.xlu0 %1647 }
 0x181   : > { %1412 = vmatprep.subr.bf16.mxu0 %v1872_v7  ;;  %1436 = vmatprep.subr.bf16.mxu1 %v1872_v7  ;;  %v1655_v48 = vunpack.i.h.bf16 %v1653_v44  ;;  %v1654_v49 = vunpack.i.l.bf16 %v1653_v44  ;;  %v1650_v50 = vunpack.i.h.bf16 %v1648_v45  ;;  %v1649_v51 = vunpack.i.l.bf16 %v1648_v45 }
 0x182   : > { %1320 = vmatprep.mubr.msk.f32.mxu0 %vm328_vm0, %v2129_v13  ;;  %1322 = vmatprep.mubr.msk.f32.mxu1 %vm328_vm0, %v2129_v13 }
 0x183   : > { %v1440_v58 = vpack.c.bf16 %v1655_v48, %v1650_v50  ;;  %v1416_v59 = vpack.c.bf16 %v1654_v49, %v1649_v51  ;;  %v370_v49 = vld [vmem:[%s2360_s3 + $0x8] sm:$0xff]  ;;  %v372_v50 = vld [vmem:[%s2360_s3 + $0x18] sm:$0xff] }
 0x184   : > { %1414 = vmatpush1.bf16.msra.mxu0 %v1413_v47  ;;  %1438 = vmatpush1.bf16.msra.mxu1 %v1437_v46  ;;  %v1663_v52 = vpop.permute.xlu1 %1662  ;;  %v1658_v53 = vpop.permute.xlu0 %1657 }
 0x185   : > { %v1665_v54 = vunpack.i.h.bf16 %v1663_v52  ;;  %v1664_v55 = vunpack.i.l.bf16 %v1663_v52  ;;  %v1660_v56 = vunpack.i.h.bf16 %v1658_v53  ;;  %v1659_v57 = vunpack.i.l.bf16 %v1658_v53  ;;  %1415 = vmatprep.subr.bf16.mxu0 %v1872_v7  ;;  %1439 = vmatprep.subr.bf16.mxu1 %v1872_v7 }
 0x187   : > { %v1443_v62 = vpack.c.bf16 %v1665_v54, %v1660_v56  ;;  %v1419_v13 = vpack.c.bf16 %v1664_v55, %v1659_v57 }
 0x188   : > { %1417 = vmatpush1.bf16.msra.mxu0 %v1416_v59  ;;  %1441 = vmatpush1.bf16.msra.mxu1 %v1440_v58  ;;  %v1673_v60 = vpop.permute.xlu1 %1672  ;;  %v1668_v61 = vpop.permute.xlu0 %1667 }
 0x189   : > { %1418 = vmatprep.subr.bf16.mxu0 %v1872_v7  ;;  %1442 = vmatprep.subr.bf16.mxu1 %v1872_v7  ;;  %v1675_v63 = vunpack.i.h.bf16 %v1673_v60  ;;  %v1674_v1 = vunpack.i.l.bf16 %v1673_v60  ;;  %v1670_v2 = vunpack.i.h.bf16 %v1668_v61  ;;  %v1669_v3 = vunpack.i.l.bf16 %v1668_v61 }
 0x18b   : > { %v1446_v11 = vpack.c.bf16 %v1675_v63, %v1670_v2  ;;  %v1422_v12 = vpack.c.bf16 %v1674_v1, %v1669_v3 }
 0x18c   : > { %1420 = vmatpush1.bf16.msra.mxu0 %v1419_v13  ;;  %1444 = vmatpush1.bf16.msra.mxu1 %v1443_v62  ;;  %v1683_v4 = vpop.permute.xlu1 %1682  ;;  %v1678_v5 = vpop.permute.xlu0 %1677 }
 0x18d   : > { %v1685_v6 = vunpack.i.h.bf16 %v1683_v4  ;;  %v1684_v8 = vunpack.i.l.bf16 %v1683_v4  ;;  %v1680_v9 = vunpack.i.h.bf16 %v1678_v5  ;;  %v1679_v10 = vunpack.i.l.bf16 %v1678_v5  ;;  %1421 = vmatprep.subr.bf16.mxu0 %v1872_v7  ;;  %1445 = vmatprep.subr.bf16.mxu1 %v1872_v7 }
 0x18f   : > { %v1449_v18 = vpack.c.bf16 %v1685_v6, %v1680_v9  ;;  %v1425_v19 = vpack.c.bf16 %v1684_v8, %v1679_v10 }
 0x190   : > { %1423 = vmatpush1.bf16.msra.mxu0 %v1422_v12  ;;  %1447 = vmatpush1.bf16.msra.mxu1 %v1446_v11  ;;  %v1693_v16 = vpop.permute.xlu1 %1692  ;;  %v1688_v17 = vpop.permute.xlu0 %1687 }
 0x191   : > { %1424 = vmatprep.subr.bf16.mxu0 %v1872_v7  ;;  %1448 = vmatprep.subr.bf16.mxu1 %v1872_v7  ;;  %v1695_v20 = vunpack.i.h.bf16 %v1693_v16  ;;  %v1694_v21 = vunpack.i.l.bf16 %v1693_v16  ;;  %v1690_v22 = vunpack.i.h.bf16 %v1688_v17  ;;  %v1689_v23 = vunpack.i.l.bf16 %v1688_v17 }
 0x193   : > { %v1452_v24 = vpack.c.bf16 %v1695_v20, %v1690_v22  ;;  %v1428_v25 = vpack.c.bf16 %v1694_v21, %v1689_v23 }
 0x194   : > { %1426 = vmatpush1.bf16.msra.mxu0 %v1425_v19  ;;  %1450 = vmatpush1.bf16.msra.mxu1 %v1449_v18  ;;  %v921_v26 = vpop.permute.xlu1 %920  ;;  %v760_v28 = vpop.permute.xlu0 %759 }
 0x195   : > { %1427 = vmatprep.subr.bf16.mxu0 %v1872_v7  ;;  %1451 = vmatprep.subr.bf16.mxu1 %v1872_v7 }
 0x198   : > { %1429 = vmatpush1.bf16.msra.mxu0 %v1428_v25  ;;  %1453 = vmatpush1.bf16.msra.mxu1 %v1452_v24 }
 0x199   : > { %794 = vmatprep.subr.mxu0 %v1870_v0  ;;  %955 = vmatprep.subr.mxu1 %v1870_v0 }
 0x19c   : > { %795 = vmatpush1.msra.mxu0 %v760_v28  ;;  %956 = vmatpush1.msra.mxu1 %v921_v26 }
 0x19d   : > { %827 = vmatmul.mubr.f32.vlgmr.msra.gmra.mrb[4].mxu0 %v2179_v27  ;;  %988 = vmatmul.mubr.f32.vlgmr.msra.gmra.mrb[4].mxu1 %v2179_v27  ;;  %v369_v27 = vld [vmem:[%s2360_s3] sm:$0xff] }
 0x19e   : > { %1321 = vmatprep.mubr.msk.f32.mxu0 %vm328_vm0, %v2187_v36  ;;  %1323 = vmatprep.mubr.msk.f32.mxu1 %vm328_vm0, %v2187_v36 }
 0x19f   : > { %1454 = vmatprep.subr.bf16.mxu0 %v1872_v7 }
 0x1a1   : > { %832 = vmatmul.mubr.f32.gmra.mrb[6].mxu0 %v2189_v37  ;;  %993 = vmatmul.mubr.f32.gmra.mrb[6].mxu1 %v2189_v37 }
 0x1a2   : > { %1355 = vmatprep.mubr.msk.f32.mxu0 %vm1890_vm4, %v1870_v0 }
 0x1a5   : > { %v426_v29 = vpop.permute.xlu0 %425  ;;  %v431_v36 = vpop.permute.xlu1 %430 }
 0x24d   : > { %v505_v30 = vpop.f32.mrb[0].mxu0  ;;  %v667_v31 = vpop.f32.mrb[0].mxu1 }
 0x24e   : > { %v506_v32 = vadd.f32 %v505_v30, %v426_v29  ;;  %v668_v33 = vadd.f32 %v667_v31, %v426_v29  ;;  %v507_v34 = vpop.f32.mrb[1].mxu0  ;;  %v669_v35 = vpop.f32.mrb[1].mxu1 }
 0x250   : > { %v514_v15 = vmul.f32 %v506_v32, %v506_v32  ;;  %v676_v14 = vmul.f32 %v668_v33, %v668_v33 }
 0x252   : > { %v678_v37 = vmul.f32 %v676_v14, %v369_v27  ;;  %v516_v39 = vmul.f32 %v514_v15, %v369_v27  ;;  %v672_v40 = vpop.f32.mrb[2].mxu1  ;;  %v510_v41 = vpop.f32.mrb[2].mxu0  ;;  %v518_v48 = vmul.f32 %v514_v15, %v2232_v38  ;;  %v680_v56 = vmul.f32 %v676_v14, %v2232_v38  ;;  %v1038_v15 = vld [vmem:[%s2362_s5] sm:$0xff] }
 0x253   : > { %v673_v42 = vadd.f32 %v672_v40, %v431_v36  ;;  %v511_v43 = vadd.f32 %v510_v41, %v431_v36  ;;  %v674_v44 = vpop.f32.mrb[3].mxu1  ;;  %v512_v45 = vpop.f32.mrb[3].mxu0 }
 0x254   : > { %v682_v46 = vsel %vm520_vm3, %v678_v37, 0.0  ;;  %v521_v47 = vsel %vm520_vm3, %v516_v39, 0.0  ;;  %v527_v55 = vsel %vm520_vm3, %v518_v48, 0.0  ;;  %v688_v61 = vsel %vm520_vm3, %v680_v56, 0.0 }
 0x255   : > { %683 = vadd.xlane.f32.xlu0 %v682_v46  ;;  %522 = vadd.xlane.f32.xlu1 %v521_v47  ;;  %v677_v51 = vmul.f32 %v673_v42, %v673_v42  ;;  %v515_v52 = vmul.f32 %v511_v43, %v511_v43 }
 0x257   : > { %v679_v53 = vmul.f32 %v677_v51, %v370_v49  ;;  %v519_v54 = vmul.f32 %v515_v52, %v372_v50  ;;  %v517_v58 = vmul.f32 %v515_v52, %v370_v49  ;;  %v681_v60 = vmul.f32 %v677_v51, %v372_v50 }
 0x259   : > { %528 = vadd.xlane.f32.xlu0 %v527_v55  ;;  %v685_v57 = vsel %vm520_vm3, %v679_v53, 0.0  ;;  %v530_v59 = vsel %vm520_vm3, %v519_v54, 0.0  ;;  %v524_v62 = vsel %vm520_vm3, %v517_v58, 0.0  ;;  %v691_v13 = vsel %vm520_vm3, %v681_v60, 0.0 }
 0x25a   : > { %686 = vadd.xlane.f32.xlu1 %v685_v57 }
 0x25d   : > { %689 = vadd.xlane.f32.xlu0 %v688_v61 }
 0x25e   : > { %531 = vadd.xlane.f32.xlu1 %v530_v59 }
 0x261   : > { %525 = vadd.xlane.f32.xlu0 %v524_v62 }
 0x262   : > { %692 = vadd.xlane.f32.xlu1 %v691_v13 }
 0x270   : > { %v828_v63 = vpop.f32.mrb[4].mxu0  ;;  %v989_v1 = vpop.f32.mrb[4].mxu1 }
 0x271   : > { %v829_v2 = vadd.f32 %v828_v63, %v426_v29  ;;  %v990_v3 = vadd.f32 %v989_v1, %v426_v29  ;;  %v830_v4 = vpop.f32.mrb[5].mxu0  ;;  %v991_v5 = vpop.f32.mrb[5].mxu1 }
 0x273   : > { %v837_v6 = vmul.f32 %v829_v2, %v829_v2  ;;  %v998_v8 = vmul.f32 %v990_v3, %v990_v3 }
 0x274   : > { %v833_v9 = vpop.f32.mrb[6].mxu0  ;;  %v994_v10 = vpop.f32.mrb[6].mxu1 }
 0x275   : > { %v834_v11 = vadd.f32 %v833_v9, %v431_v36  ;;  %v995_v12 = vadd.f32 %v994_v10, %v431_v36  ;;  %v835_v16 = vpop.f32.mrb[7].mxu0  ;;  %v996_v17 = vpop.f32.mrb[7].mxu1  ;;  %v839_v18 = vmul.f32 %v837_v6, %v369_v27  ;;  %v1000_v22 = vmul.f32 %v998_v8, %v369_v27 }
 0x276   : > { %v841_v26 = vmul.f32 %v837_v6, %v2232_v38  ;;  %v1002_v31 = vmul.f32 %v998_v8, %v2232_v38 }
 0x277   : > { %v838_v19 = vmul.f32 %v834_v11, %v834_v11  ;;  %v999_v20 = vmul.f32 %v995_v12, %v995_v12  ;;  %v843_v21 = vsel %vm520_vm3, %v839_v18, 0.0  ;;  %v1004_v24 = vsel %vm520_vm3, %v1000_v22, 0.0 }
 0x278   : > { %844 = vadd.xlane.f32.xlu0 %v843_v21  ;;  %v849_v29 = vsel %vm520_vm3, %v841_v26, 0.0  ;;  %v1010_v33 = vsel %vm520_vm3, %v1002_v31, 0.0 }
 0x279   : > { %v840_v23 = vmul.f32 %v838_v19, %v370_v49  ;;  %v1001_v28 = vmul.f32 %v999_v20, %v370_v49  ;;  %v842_v32 = vmul.f32 %v838_v19, %v372_v50  ;;  %v1003_v35 = vmul.f32 %v999_v20, %v372_v50 }
 0x27b   : > { %v846_v25 = vsel %vm520_vm3, %v840_v23, 0.0  ;;  %v1007_v30 = vsel %vm520_vm3, %v1001_v28, 0.0  ;;  %v852_v34 = vsel %vm520_vm3, %v842_v32, 0.0  ;;  %v1013_v27 = vsel %vm520_vm3, %v1003_v35, 0.0 }
 0x27c   : > { %1005 = vadd.xlane.f32.xlu0 %v1004_v24  ;;  %847 = vadd.xlane.f32.xlu1 %v846_v25 }
 0x280   : > { %850 = vadd.xlane.f32.xlu0 %v849_v29  ;;  %1008 = vadd.xlane.f32.xlu1 %v1007_v30 }
 0x284   : > { %1011 = vadd.xlane.f32.xlu0 %v1010_v33  ;;  %853 = vadd.xlane.f32.xlu1 %v852_v34 }
 0x288   : > { %1014 = vadd.xlane.f32.xlu1 %v1013_v27 }
 0x29a   : > { %1041 = vperm.xlu0 %1696, %v1038_v15  }
 0x2e2   : > { %v684_v14 = vpop.xlane.xlu0 %683  ;;  %v523_v36 = vpop.xlane.xlu1 %522 }
 0x2e3   : > { %v694_v38 = vmax.f32 %v684_v14, 1e-10  ;;  %v533_v37 = vmax.f32 %v523_v36, 1e-10 }
 0x2e5   : > { %1702 = vlog2.f32 %v694_v38 }
 0x2e6   : > { %1704 = vlog2.f32 %v533_v37  ;;  %v529_v39 = vpop.xlane.xlu0 %528 }
 0x2e7   : > { %v535_v40 = vmax.f32 %v529_v39, 1e-10  ;;  %v687_v41 = vpop.xlane.xlu1 %686 }
 0x2e8   : > { %v695_v42 = vmax.f32 %v687_v41, 1e-10 }
 0x2e9   : > { %1706 = vlog2.f32 %v535_v40 }
 0x2ea   : > { %v690_v43 = vpop.xlane.xlu0 %689  ;;  %1708 = vlog2.f32 %v695_v42 }
 0x2eb   : > { %v696_v44 = vmax.f32 %v690_v43, 1e-10  ;;  %v532_v45 = vpop.xlane.xlu1 %531  ;;  %v1033_v43 = vld [vmem:[%s2361_s4] sm:$0xff] }
 0x2ec   : > { %v536_v46 = vmax.f32 %v532_v45, 1e-10 }
 0x2ed   : > { %1710 = vlog2.f32 %v696_v44  ;;  %v1891_v44 = vmov 1  }
 0x2ee   : > { %1712 = vlog2.f32 %v536_v46  ;;  %v526_v47 = vpop.xlane.xlu0 %525  ;;  %1698 = vset.pattern.permute.xlu0 %v1891_v44 }
 0x2ef   : > { %v1703_v48 = vpop.eup %1702  ;;  %v534_v49 = vmax.f32 %v526_v47, 1e-10  ;;  %v693_v50 = vpop.xlane.xlu1 %692 }
 0x2f0   : > { %v1705_v51 = vpop.eup %1704  ;;  %v699_v52 = vmul.f32 0.6931472, %v1703_v48  ;;  %v697_v53 = vmax.f32 %v693_v50, 1e-10  ;;  %v1893_v50 = vmov 3  }
 0x2f1   : > { %v538_v54 = vmul.f32 0.6931472, %v1705_v51  ;;  %1714 = vlog2.f32 %v534_v49  ;;  %v1892_v49 = vmov 2   ;;  %v1122_v51 = vld [vmem:[%s2081_s11] sm:$0xff] }
 0x2f2   : > { %1716 = vlog2.f32 %v697_v53 }
 0x2f3   : > { %v1707_v55 = vpop.eup %1706  ;;  %546 = vst.msk [vmem:[#allocation3] sm:$0xff] %vm545_vm5, %v538_v54 }
 0x2f4   : > { %707 = vst.msk [vmem:[#allocation3] sm:$0xff] %vm706_vm6, %v699_v52  ;;  %v542_v56 = vmul.f32 0.6931472, %v1707_v55  ;;  %v1709_v57 = vpop.eup %1708 }
 0x2f5   : > { %v701_v13 = vmul.f32 0.6931472, %v1709_v57 }
 0x2f6   : > { %548 = vst.msk [vmem:[#allocation3 + $0x10] sm:$0xff] %vm545_vm5, %v542_v56 }
 0x2f7   : > { %v1711_v58 = vpop.eup %1710 }
 0x2f8   : > { %v1713_v59 = vpop.eup %1712  ;;  %v703_v60 = vmul.f32 0.6931472, %v1711_v58 }
 0x2f9   : > { %v544_v61 = vmul.f32 0.6931472, %v1713_v59  ;;  %v1330_v59 = vld [vmem:[%s2081_s11 + $0x10] sm:$0xff] }
 0x2fa   : > { %709 = vst.msk [vmem:[#allocation3 + $0x10] sm:$0xff] %vm706_vm6, %v703_v60 }
 0x2fb   : > { %v1715_v62 = vpop.eup %1714  ;;  %549 = vst.msk [vmem:[#allocation3 + $0x18] sm:$0xff] %vm545_vm5, %v544_v61 }
 0x2fc   : > { %v1717_v63 = vpop.eup %1716  ;;  %v540_v1 = vmul.f32 0.6931472, %v1715_v62  ;;  %v1333_v62 = vld [vmem:[%s2081_s11 + $0x18] sm:$0xff] }
 0x2fd   : > { %v705_v2 = vmul.f32 0.6931472, %v1717_v63 }
 0x2fe   : > { %547 = vst.msk [vmem:[#allocation3 + $0x8] sm:$0xff] %vm545_vm5, %v540_v1 }
 0x2ff   : > { %708 = vst.msk [vmem:[#allocation3 + $0x8] sm:$0xff] %vm706_vm6, %v701_v13  ;;  %710 = vst.msk [vmem:[#allocation3 + $0x18] sm:$0xff] %vm706_vm6, %v705_v2 }
 0x305   : > { %v845_v3 = vpop.xlane.xlu0 %844 }
 0x306   : > { %v855_v4 = vmax.f32 %v845_v3, 1e-10 }
 0x308   : > { %1718 = vlog2.f32 %v855_v4 }
 0x309   : > { %v1006_v5 = vpop.xlane.xlu0 %1005  ;;  %v848_v6 = vpop.xlane.xlu1 %847 }
 0x30a   : > { %v1016_v8 = vmax.f32 %v1006_v5, 1e-10  ;;  %v856_v9 = vmax.f32 %v848_v6, 1e-10 }
 0x30c   : > { %1720 = vlog2.f32 %v1016_v8 }
 0x30d   : > { %1722 = vlog2.f32 %v856_v9  ;;  %v851_v10 = vpop.xlane.xlu0 %850  ;;  %v1009_v11 = vpop.xlane.xlu1 %1008 }
 0x30e   : > { %v857_v12 = vmax.f32 %v851_v10, 1e-10  ;;  %v1017_v16 = vmax.f32 %v1009_v11, 1e-10 }
 0x310   : > { %1724 = vlog2.f32 %v857_v12 }
 0x311   : > { %1726 = vlog2.f32 %v1017_v16  ;;  %v1012_v17 = vpop.xlane.xlu0 %1011  ;;  %v854_v18 = vpop.xlane.xlu1 %853 }
 0x312   : > { %v1719_v19 = vpop.eup %1718  ;;  %v1018_v20 = vmax.f32 %v1012_v17, 1e-10  ;;  %v858_v21 = vmax.f32 %v854_v18, 1e-10 }
 0x313   : > { %v860_v22 = vmul.f32 0.6931472, %v1719_v19 }
 0x314   : > { %1728 = vlog2.f32 %v1018_v20 }
 0x315   : > { %868 = vst.msk [vmem:[#allocation3] sm:$0xff] %vm867_vm7, %v860_v22  ;;  %1730 = vlog2.f32 %v858_v21  ;;  %v1015_v23 = vpop.xlane.xlu1 %1014 }
 0x316   : > { %v1721_v24 = vpop.eup %1720  ;;  %v1019_v25 = vmax.f32 %v1015_v23, 1e-10 }
 0x317   : > { %v1723_v26 = vpop.eup %1722  ;;  %v1021_v28 = vmul.f32 0.6931472, %v1721_v24 }
 0x318   : > { %v862_v29 = vmul.f32 0.6931472, %v1723_v26  ;;  %1732 = vlog2.f32 %v1019_v25 }
 0x319   : > { %1029 = vst.msk [vmem:[#allocation3] sm:$0xff] %vm1028_vm8, %v1021_v28  ;;  %v1042_v45 = vpop.permute.xlu0 %1041 }
 0x31a   : > { %v1725_v30 = vpop.eup %1724  ;;  %869 = vst.msk [vmem:[#allocation3 + $0x8] sm:$0xff] %vm867_vm7, %v862_v29 }
 0x31b   : > { %v1727_v31 = vpop.eup %1726  ;;  %v864_v32 = vmul.f32 0.6931472, %v1725_v30 }
 0x31c   : > { %v1023_v33 = vmul.f32 0.6931472, %v1727_v31 }
 0x31d   : > { %870 = vst.msk [vmem:[#allocation3 + $0x10] sm:$0xff] %vm867_vm7, %v864_v32 }
 0x31e   : > { %v1729_v34 = vpop.eup %1728  ;;  %1030 = vst.msk [vmem:[#allocation3 + $0x8] sm:$0xff] %vm1028_vm8, %v1023_v33 }
 0x31f   : > { %v1731_v35 = vpop.eup %1730  ;;  %v1025_v27 = vmul.f32 0.6931472, %v1729_v34 }
 0x320   : > { %v866_v15 = vmul.f32 0.6931472, %v1731_v35  ;;  %v1034_v38 = vld [vmem:[#allocation3] sm:$0xff] }
 0x321   : > { %1031 = vst.msk [vmem:[#allocation3 + $0x10] sm:$0xff] %vm1028_vm8, %v1025_v27 }
 0x322   : > { %v1733_v14 = vpop.eup %1732  ;;  %871 = vst.msk [vmem:[#allocation3 + $0x18] sm:$0xff] %vm867_vm7, %v866_v15 }
 0x323   : > { %v1027_v36 = vmul.f32 0.6931472, %v1733_v14 }
 0x325   : > { %1032 = vst.msk [vmem:[#allocation3 + $0x18] sm:$0xff] %vm1028_vm8, %v1027_v36  ;;  %v1035_v37 = vld [vmem:[#allocation3 + $0x8] sm:$0xff] }
 0x326   : > { %v1455_v39 = vpack.c.bf16 %v1035_v37, %v1034_v38 }
 0x328   : > { %1456 = vmatpush3.bf16.msra.mxu0 %v1455_v39  ;;  %v1036_v40 = vld [vmem:[#allocation3 + $0x10] sm:$0xff] }
 0x329   : > { %1457 = vmatprep.subr.bf16.mxu0 %v1872_v7 }
 0x32c   : > { %v1037_v41 = vld [vmem:[#allocation3 + $0x18] sm:$0xff] }
 0x32d   : > { %v1458_v42 = vpack.c.bf16 %v1037_v41, %v1036_v40 }
 0x32f   : > { %1459 = vmatpush3.bf16.msra.mxu0 %v1458_v42 }
 0x332   : > { %1356 = vmatmul.mubr.msk.f32.vlgmr.msra.gmra.mrb[8].mxu0 %vm1044_vm9, %v1033_v43 }
 0x405   : > { %v1114_v46 = vpop.f32.mrb[8].mxu0 }
 0x406   : > { %v1115_v47 = vadd.f32 %v1114_v46, %v1042_v45  ;;  %v1357_v7 = vpop.f32.mrb[9].mxu0 }
 0x408   : > { %vm1118_vm10 = vcmp.ge.f32.partialorder %v1115_v47, 0.0 }
 0x409   : > { %v1325_v48 = vsel %vm1118_vm10, 1.0, %v1870_v0  ;;  %v1327_v0 = vld [vmem:[%s2081_s11 + $0x8] sm:$0xff]  ;;  %s1796_s11 = sshll.u32 %s1894_s28, 4  ;;  %s1797_s11 = int_to_ptr.vmem [resolvable:$false] %s1796_s11 }
 0x40a   : > { %1138 = vperm.xlu0 %1698, %v1325_v48   ;;  %1125 = vperm.xlu1 %1697, %v1325_v48   ;;  %1121 = vst.msk [vmem:[%s326_s16] sm:$0xff] %vm545_vm5, %v1325_v48  ;;  %s1798_s1 = scalar_lea.vmem %s1797_s11, 1024 }
 0x40e   : > { %1158 = vrot.lane.b32.xlu0 %v1325_v48, %s1876_s15  ;;  %1130 = vrot.lane.b32.xlu1 %v1325_v48, %s2397_s14  ;;  %s2398_s15 = sshll.u32 %s2075_s12, 5 }
 0x40f   : > { %1699 = vset.pattern.permute.xlu1 %v1892_v49  ;;  %1701 = vset.pattern.permute.xlu0 %v1893_v50  ;;  %s312_s29 = scalar_lea.vmem [#allocation9], %s2398_s15 }
 0x412   : > { %1144 = vrot.lane.b32.xlu1 %v1325_v48, %s1873_s9  ;;  %s1191_s9 = sshll.u32 %s312_s29, 4  ;;  %s2306_s9 = int_to_ptr.vmem [resolvable:$true] %s1191_s9 }
 0x413   : > { %s1792_s0 = scalar_lea.vmem %s2306_s9, 512  ;;  %p1799_p13 = scmp.lt.s32.totalorder %s2306_s9, %s1797_s11 }
 0x414   : > { %p1793_p6 = scmp.ne.s32.totalorder %s2306_s9, %s1792_s0  ;;  %p1800_p3 = scmp.lt.s32.totalorder %s1798_s1, %s1792_s0 }
 0x416   : > { %1152 = vperm.xlu1 %1699, %v1325_v48   ;;  %p1794_p8 = pnand %p1793_p6, %p2027_p12  ;;  %p1801_p7 = por %p1800_p3, %p1799_p13 }
 0x418   : > { %p1795_p10 = pneg %p1794_p8 }
 0x41a   : > { %1700 = vset.pattern.permute.xlu1 %v1893_v50  ;;  %p1802_p9 = pnand %p1801_p7, %p1795_p10 }
 0x41b   : > { %1166 = vperm.xlu1 %1700, %v1325_v48  }
 0x489   : > { %v1139_v52 = vpop.permute.xlu0 %1138  ;;  %v1126_v53 = vpop.permute.xlu1 %1125 }
 0x48a   : > { %v1141_v54 = vmul.f32 %v1327_v0, %v1139_v52  ;;  %v1128_v55 = vmul.f32 %v1126_v53, %v1122_v51 }
 0x48c   : > { %1328 = vst.msk [vmem:[%s312_s29 + $0x8] sm:$0xff] %vm520_vm3, %v1141_v54  ;;  %1129 = vst.msk [vmem:[%s312_s29] sm:$0xff] %vm520_vm3, %v1128_v55 }
 0x48d   : > { %v1131_v56 = vpop.permute.xlu1 %1130  ;;  %v1159_v58 = vpop.permute.xlu0 %1158 }
 0x48e   : > { %1326 = vst.msk [vmem:[%s326_s16 + $0x8] sm:$0xff] %vm545_vm5, %v1131_v56  ;;  %1332 = vst.msk [vmem:[%s326_s16 + $0x18] sm:$0xff] %vm545_vm5, %v1159_v58 }
 0x491   : > { %v1145_v57 = vpop.permute.xlu1 %1144 }
 0x492   : > { %1329 = vst.msk [vmem:[%s326_s16 + $0x10] sm:$0xff] %vm545_vm5, %v1145_v57 }
 0x495   : > { %v1153_v60 = vpop.permute.xlu1 %1152 }
 0x496   : > { %v1155_v61 = vmul.f32 %v1330_v59, %v1153_v60 }
 0x498   : > { %1331 = vst.msk [vmem:[%s312_s29 + $0x10] sm:$0xff] %vm520_vm3, %v1155_v61 }
 0x49a   : > { %v1167_v13 = vpop.permute.xlu1 %1166 }
 0x49b   : > { %v1169_v63 = vmul.f32 %v1333_v62, %v1167_v13 }
 0x49d   : > { %1334 = vst.msk [vmem:[%s312_s29 + $0x18] sm:$0xff] %vm520_vm3, %v1169_v63 }
 0x49e   : > { %1805 = shalt.err (!%p1802_p9)
}
 0x49f   : > { %s1806_s18 = scalar_lea.hbm %s2311_s17, 512  ;;  %s1810_s16 = scalar_lea.hbm %s2363_s6, 1024 }
 0x4a0   : > { %p1807_p2 = scmp.ne.s32.totalorder %s2311_s17, %s1806_s18  ;;  %p1811_p11 = scmp.lt.u32.totalorder %s2311_s17, %s2363_s6 }
 0x4a1   : > { %p1812_p1 = scmp.lt.u32.totalorder %s1810_s16, %s1806_s18  ;;  %p1814_p6 = scmp.lt.u32.totalorder %s1806_s18, %s2311_s17 }
 0x4a2   : > { %p1808_p0 = pnand %p1807_p2, %p2027_p12 }
 0x4a3   : > { %p1813_p4 = por %p1812_p1, %p1811_p11 }
 0x4a4   : > { %p1809_p5 = pneg %p1808_p0 }
 0x4a5   : > { %p1815_p8 = por %p1814_p6, %p1813_p4 }
 0x4a7   : > { %p1816_p10 = pnand %p1815_p8, %p1809_p5 }
 0x4a9   : > { %1819 = shalt.err (!%p1816_p10)
}
 0x4aa   : > { %s1895_s29 = smov 128   ;;  %s2399_s10 = smov 8  }
 0x4ab   : > { %1466 = dma.vmem_to_hbm [thread:$0]  (%p2027_p12), %s2306_s9, 512, %s2311_s17, %s1173_s21, %s1895_s29, %s1895_s29, %s2399_s10  }
 0x4ac PF: > { %s1210_s22 = sand.u32 1, %s1850_s24   ;;  %p2400_p13 = scmp.ne.s32.totalorder %s2379_s8, 0 }
 0x4ad   : > { %p2401_p3 = scmp.ge.s32.totalorder %s1862_s27, 2  ;;  %s1211_s20 = scalar_lea.sflag [#allocation6], %s1210_s22 }
 0x4af   : > { %p1477_p7 = pnand %p2401_p3, %p2400_p13 }
 0x4b1   : > { %1845 = dma.done.wait (!%p1477_p7), %s1211_s20, 512  }
 0x4b2   : > { %1847 = vsyncadd (!%p1477_p7), %s1211_s20, 4294966784  ;;  %s2402_s19 = sld [smem:[#allocation13_spill]]  ;;  %p22_p9 = scmp.ge.s32.totalorder %s1992_s13, 4  }
 0x4b3   : > { %s2403_s24 = smov %s1854_s25  ;;  %s2404_s25 = smov %s1858_s26 }
 0x4b4   : > { %s2406_s27 = smov %s1992_s13  ;;  %24 = sbr.rel (!%p22_p9) target bundleno = 9 (0x9), region = 117 }
 0x4b8   : > { %s2405_s26 = smov %s2402_s19 }
 0x4bb   :  { %1224 = vsyncpa [#allocation5], 1 }
 0x4bc   :  { %1226 = vsyncpa [#allocation5 + $0x1], 1 }
 0x4bd   :  { %1227 = vsyncpa [#allocation8], 1 }
 0x4be   :  { %1228 = vsyncpa [#allocation6], 1 }
 0x4bf   :  { %1230 = vsyncpa [#allocation6 + $0x1], 1 }

</bundles_post_ra>
